<compile_context>
chip_gen: v6e
topology: v6e:2x2x1
jax: 0.10.0
libtpu: 0.0.40
codegen_flags: <defaults>
</compile_context>

<pallas_src>
import functools
import math

import jax
import jax.numpy as jnp
import numpy as np
from jax.experimental import pallas as pl
from jax.experimental.pallas import tpu as pltpu

INPUT_SIZE = 512
FILTER_SIZE = 256
LN_EPS = 1e-5


def _round_up(v, m):
    return ((v + m - 1) // m) * m


# ----------------------------------------------------------------------------
# Kernel 1: DurationPredictor
#   (conv1d k=3 pad=1 -> LayerNorm -> ReLU) x2 -> Linear(256,1) -> ReLU
#   Batch folded into MXU rows; output is lane-dense (B, T_pad).
# ----------------------------------------------------------------------------
def duration_predictor_kernel(x_ref, w1_ref, b1_ref, g1_ref, be1_ref,
                              w2_ref, b2_ref, g2_ref, be2_ref,
                              wl_ref, bl_ref, out_ref, *, B, T, T_pad):
    R = B * T_pad

    # Per-row position inside its (padded) sequence -> conv boundary masks.
    row = jax.lax.broadcasted_iota(jnp.int32, (R, 1), 0)
    t = row % T_pad
    prev_ok = (t > 0).astype(jnp.float32)        # tap k=0 (x[i-1]) stays in-sequence
    next_ok = (t < T - 1).astype(jnp.float32)    # tap k=2 (x[i+1]) stays in-sequence

    def conv3(xin, w_ref, b_ref):
        # out[i] = x[i-1] @ w[0] + x[i] @ w[1] + x[i+1] @ w[2] + b
        # Three aligned matmuls on the un-shifted input; shift the *outputs*
        # with sublane rolls (XLU) and mask the sequence boundaries (zero pad).
        p = jnp.dot(xin, w_ref[0], preferred_element_type=jnp.float32)
        c = jnp.dot(xin, w_ref[1], preferred_element_type=jnp.float32)
        n = jnp.dot(xin, w_ref[2], preferred_element_type=jnp.float32)
        p = pltpu.roll(p, shift=1, axis=0) * prev_ok        # p[i-1]
        n = pltpu.roll(n, shift=R - 1, axis=0) * next_ok    # n[i+1]
        return c + p + n + b_ref[...]

    def ln_relu(h, g_ref, be_ref):
        mu = jnp.mean(h, axis=-1, keepdims=True)
        var = jnp.mean(jnp.square(h - mu), axis=-1, keepdims=True)
        h = (h - mu) * jax.lax.rsqrt(var + LN_EPS) * g_ref[...] + be_ref[...]
        return jnp.maximum(h, 0.0)

    x = x_ref[...]                                             # (R, 512) bf16
    h = ln_relu(conv3(x, w1_ref, b1_ref), g1_ref, be1_ref)     # (R, 256) f32
    h = ln_relu(conv3(h.astype(jnp.bfloat16), w2_ref, b2_ref), g2_ref, be2_ref)

    # Linear(256 -> 1) as a VPU lane reduction + ReLU, lane-dense (B, T_pad).
    h3 = h.reshape(B, T_pad, FILTER_SIZE)
    d = jnp.sum(h3 * wl_ref[...], axis=-1) + bl_ref[...]
    out_ref[...] = jnp.maximum(d, 0.0)


# ----------------------------------------------------------------------------
# Kernel 2: Length regulation (expand + pad) as a one-hot matmul gather,
#           tiled over the mel axis.
# ----------------------------------------------------------------------------
def length_regulate_kernel(starts_ref, ends_ref, x_ref, out_ref, *, TM):
    T = x_ref.shape[1]
    m0 = pl.program_id(1) * TM
    # Integer mel-frame index of each output row in this tile (exact compares).
    frame = jax.lax.broadcasted_iota(jnp.int32, (TM, T), 0) + m0
    s = starts_ref[0]                                          # (1, T) int32
    e = ends_ref[0]                                            # (1, T) int32
    w = ((frame >= s) & (frame < e)).astype(x_ref.dtype)       # one-hot rows (TM, T)
    # Exact row-copy expansion; rows past the total duration stay 0 (== pad).
    # (For bit-exact f32 copies one could request precision=HIGHEST here.)
    out_ref[0] = jnp.dot(w, x_ref[0],
                         preferred_element_type=jnp.float32).astype(out_ref.dtype)


# ----------------------------------------------------------------------------
# Parameter init (deterministic, xavier_uniform like the PyTorch module)
# ----------------------------------------------------------------------------
def _xavier(key, shape, fan_in, fan_out, gain=1.0):
    bound = gain * math.sqrt(6.0 / (fan_in + fan_out))
    return jax.random.uniform(key, shape, jnp.float32, -bound, bound)


def init_params(key):
    ks = jax.random.split(key, 6)
    # conv1d_1 weight stored as (k, in, out) = (3, 512, 256)
    w1 = _xavier(ks[0], (3, INPUT_SIZE, FILTER_SIZE),
                 fan_in=INPUT_SIZE * 3, fan_out=FILTER_SIZE * 3)
    b1 = jax.random.uniform(ks[1], (1, FILTER_SIZE), jnp.float32,
                            -1.0 / math.sqrt(INPUT_SIZE * 3),
                            1.0 / math.sqrt(INPUT_SIZE * 3))
    # conv1d_2 weight: (3, 256, 256)
    w2 = _xavier(ks[2], (3, FILTER_SIZE, FILTER_SIZE),
                 fan_in=FILTER_SIZE * 3, fan_out=FILTER_SIZE * 3)
    b2 = jax.random.uniform(ks[3], (1, FILTER_SIZE), jnp.float32,
                            -1.0 / math.sqrt(FILTER_SIZE * 3),
                            1.0 / math.sqrt(FILTER_SIZE * 3))
    # layer norms: PyTorch default init
    g1 = jnp.ones((1, FILTER_SIZE), jnp.float32)
    be1 = jnp.zeros((1, FILTER_SIZE), jnp.float32)
    g2 = jnp.ones((1, FILTER_SIZE), jnp.float32)
    be2 = jnp.zeros((1, FILTER_SIZE), jnp.float32)
    # linear 256 -> 1, stored as a (1, 256) row for the in-kernel lane reduction
    wl = _xavier(ks[4], (1, FILTER_SIZE), fan_in=FILTER_SIZE, fan_out=1)
    bl = jax.random.uniform(ks[5], (1, 1), jnp.float32,
                            -1.0 / math.sqrt(FILTER_SIZE),
                            1.0 / math.sqrt(FILTER_SIZE))
    return dict(w1=w1, b1=b1, g1=g1, be1=be1, w2=w2, b2=b2, g2=g2, be2=be2,
                wl=wl, bl=bl)


# ----------------------------------------------------------------------------
# Wrappers
# ----------------------------------------------------------------------------
def duration_predictor(params, x):
    """Eval-mode DurationPredictor; returns (1, B, T) like torch's forward."""
    B, T, D = x.shape
    assert D == INPUT_SIZE
    T_pad = max(8, _round_up(T, 8))
    if T_pad != T:
        x = jnp.pad(x, ((0, 0), (0, T_pad - T), (0, 0)))
    # Fold batch into MXU rows; bf16 activations (f32 accumulation in-kernel).
    x_rows = x.reshape(B * T_pad, D).astype(jnp.bfloat16)

    # Single fused invocation: all operands (x rows, weights, (R,256) f32
    # intermediates) stay in VMEM — fine for TTS-sized B*T.
    kernel = functools.partial(duration_predictor_kernel, B=B, T=T, T_pad=T_pad)
    out = pl.pallas_call(
        kernel,
        out_shape=jax.ShapeDtypeStruct((B, T_pad), jnp.float32),
    )(x_rows,
      params["w1"].astype(jnp.bfloat16), params["b1"], params["g1"], params["be1"],
      params["w2"].astype(jnp.bfloat16), params["b2"], params["g2"], params["be2"],
      params["wl"], params["bl"])

    out = out[:, :T]
    # torch: .squeeze() then (eval mode) .unsqueeze(0) -> (1, B, T)
    return out[None, ...]


def length_regulate(x, target, alpha=1.0, mel_max_length=None):
    """LR/expand/pad: out[b, m] = x[b, t] for m in [start[b, t], end[b, t])."""
    B, T, D = x.shape
    dur = target.astype(jnp.int32)
    if alpha != 1.0:
        dur = (dur.astype(jnp.float32) * alpha).astype(jnp.int32)  # int(d * alpha)
    ends = jnp.cumsum(dur, axis=1)                                 # (B, T) int32
    starts = ends - dur

    if mel_max_length is not None:
        M = int(mel_max_length)          # static path: no host sync, stable shapes
    else:
        # Data-dependent output length (torch pads to the max total duration);
        # this is one unavoidable device->host sync. Prefer passing mel_max_length.
        M = int(jax.device_get(jnp.max(ends[:, -1])))

    # Mel-axis tiling: 256-row tiles (multiple of 128 for v5e, v6e/v7x sweet
    # spot). Output block (1, TM, 512) f32 = 512 KiB -> well inside every
    # generation's VMEM budget even double-buffered.
    if M <= 256:
        TM = max(8, _round_up(M, 8))
    else:
        TM = 256
    M_pad = _round_up(M, TM)

    starts3 = starts[:, None, :]         # (B, 1, T): per-batch (1, 1, T) blocks
    ends3 = ends[:, None, :]

    out = pl.pallas_call(
        functools.partial(length_regulate_kernel, TM=TM),
        out_shape=jax.ShapeDtypeStruct((B, M_pad, D), x.dtype),
        grid=(B, M_pad // TM),
        in_specs=[
            pl.BlockSpec((1, 1, T), lambda b, m: (b, 0, 0)),
            pl.BlockSpec((1, 1, T), lambda b, m: (b, 0, 0)),
            pl.BlockSpec((1, T, D), lambda b, m: (b, 0, 0)),
        ],
        out_specs=pl.BlockSpec((1, TM, D), lambda b, m: (b, m, 0)),
        compiler_params=pltpu.CompilerParams(
            dimension_semantics=("parallel", "parallel")),
    )(starts3, ends3, x)
    return out[:, :M, :]


def length_regulator_forward(params, x, alpha=1.0, target=None, mel_max_length=None):
    """Mirrors LengthRegulator.forward: returns (output, duration_predictor_output)."""
    dpo = duration_predictor(params, x)                          # (1, B, T)
    output = length_regulate(x, target, 1.0, mel_max_length)     # (B, mel_len, 512)
    return output, dpo


# ----------------------------------------------------------------------------
# Main
# ----------------------------------------------------------------------------
if __name__ == "__main__":
    key = jax.random.PRNGKey(0)
    k_param, k_x, k_dur = jax.random.split(key, 3)

    B, T, D = 2, 8, INPUT_SIZE
    params = init_params(k_param)
    x = jax.random.normal(k_x, (B, T, D), jnp.float32)
    # integer phoneme durations (the `target` argument of forward)
    target = jax.random.randint(k_dur, (B, T), minval=1, maxval=4, dtype=jnp.int32)

    output, dpo = length_regulator_forward(params, x, target=target)
    output = jax.block_until_ready(output)
    dpo = jax.block_until_ready(dpo)

    M = int(jnp.max(jnp.sum(target, axis=1)))
    assert output.shape == (B, M, D)
    assert dpo.shape == (1, B, T)
    assert bool(jnp.all(jnp.isfinite(output))) and bool(jnp.all(jnp.isfinite(dpo)))

    # Independent reference for the length regulator (expand + pad).
    xs = np.asarray(x, dtype=np.float32)
    tgt = np.asarray(target)
    ref = np.zeros((B, M, D), np.float32)
    for b in range(B):
        rows = np.repeat(xs[b], tgt[b], axis=0)
        ref[b, :rows.shape[0]] = rows
    # tolerance covers the TPU MXU's default f32 matmul precision
    assert np.allclose(np.asarray(output), ref, rtol=2e-2, atol=2e-2)

    print("KERNEL_OK")
</pallas_src>

<mosaic_0001>
module attributes {stable_mosaic.version = 11 : i64} {
  func.func @duration_predictor_kernel(%arg0: memref<16x512xbf16, #tpu.memory_space<vmem>>, %arg1: memref<3x512x256xbf16, #tpu.memory_space<vmem>>, %arg2: memref<1x256xf32, #tpu.memory_space<vmem>>, %arg3: memref<1x256xf32, #tpu.memory_space<vmem>>, %arg4: memref<1x256xf32, #tpu.memory_space<vmem>>, %arg5: memref<3x256x256xbf16, #tpu.memory_space<vmem>>, %arg6: memref<1x256xf32, #tpu.memory_space<vmem>>, %arg7: memref<1x256xf32, #tpu.memory_space<vmem>>, %arg8: memref<1x256xf32, #tpu.memory_space<vmem>>, %arg9: memref<1x256xf32, #tpu.memory_space<vmem>>, %arg10: memref<1x1xf32, #tpu.memory_space<vmem>>, %arg11: memref<2x8xf32, #tpu.memory_space<vmem>>) attributes {dimension_semantics = [], scalar_prefetch = 0 : i64, scratch_operands = 0 : i64, tpu.core_type = #tpu.core_type<tc>} {
    %0 = tpu.iota {dimensions = array<i32: 0>} : vector<16x1xi32>
    %c8_i32 = arith.constant 8 : i32
    %c0_i32 = arith.constant 0 : i32
    %1 = arith.cmpi eq, %c8_i32, %c0_i32 : i32
    %c1_i32 = arith.constant 1 : i32
    %2 = arith.select %1, %c1_i32, %c8_i32 : i32
    %3 = vector.broadcast %2 : i32 to vector<16x1xi32>
    %4 = arith.remsi %0, %3 : vector<16x1xi32>
    %c0_i32_0 = arith.constant 0 : i32
    %5 = vector.broadcast %c0_i32_0 : i32 to vector<16x1xi32>
    %6 = arith.cmpi ne, %4, %5 : vector<16x1xi32>
    %c0_i32_1 = arith.constant 0 : i32
    %7 = vector.broadcast %c0_i32_1 : i32 to vector<16x1xi32>
    %8 = arith.cmpi slt, %4, %7 : vector<16x1xi32>
    %c0_i32_2 = arith.constant 0 : i32
    %9 = arith.cmpi slt, %2, %c0_i32_2 : i32
    %10 = vector.broadcast %9 : i1 to vector<16x1xi1>
    %11 = vector.broadcast %10 : vector<16x1xi1> to vector<16x1xi1>
    %12 = arith.xori %8, %11 : vector<16x1xi1>
    %13 = arith.andi %12, %6 : vector<16x1xi1>
    %14 = vector.broadcast %2 : i32 to vector<16x1xi32>
    %15 = arith.addi %4, %14 : vector<16x1xi32>
    %16 = arith.select %13, %15, %4 : vector<16x1xi1>, vector<16x1xi32>
    %c0_i32_3 = arith.constant 0 : i32
    %17 = vector.broadcast %c0_i32_3 : i32 to vector<16x1xi32>
    %18 = arith.cmpi sgt, %16, %17 : vector<16x1xi32>
    %19 = arith.extui %18 : vector<16x1xi1> to vector<16x1xi32>
    %20 = arith.sitofp %19 : vector<16x1xi32> to vector<16x1xf32>
    %c7_i32 = arith.constant 7 : i32
    %21 = vector.broadcast %c7_i32 : i32 to vector<16x1xi32>
    %22 = arith.cmpi slt, %16, %21 : vector<16x1xi32>
    %23 = arith.extui %22 : vector<16x1xi1> to vector<16x1xi32>
    %24 = arith.sitofp %23 : vector<16x1xi32> to vector<16x1xf32>
    %c0 = arith.constant 0 : index
    %c0_4 = arith.constant 0 : index
    %25 = vector.load %arg0[%c0, %c0_4] : memref<16x512xbf16, #tpu.memory_space<vmem>>, vector<16x512xbf16>
    %c0_5 = arith.constant 0 : index
    %c0_6 = arith.constant 0 : index
    %c0_7 = arith.constant 0 : index
    %26 = vector.load %arg1[%c0_5, %c0_6, %c0_7] : memref<3x512x256xbf16, #tpu.memory_space<vmem>>, vector<1x512x256xbf16>
    %27 = vector.shape_cast %26 : vector<1x512x256xbf16> to vector<512x256xbf16>
    %cst = arith.constant dense<0.000000e+00> : vector<16x256xf32>
    %28 = tpu.matmul %25, %27, %cst {dimension_numbers = #tpu.dot_dimension_numbers<[1], [0], [0], [1], [0, 0, 1, 1], [], []>} : vector<16x512xbf16>, vector<512x256xbf16>, vector<16x256xf32> -> vector<16x256xf32>
    %c1 = arith.constant 1 : index
    %c0_8 = arith.constant 0 : index
    %c0_9 = arith.constant 0 : index
    %29 = vector.load %arg1[%c1, %c0_8, %c0_9] : memref<3x512x256xbf16, #tpu.memory_space<vmem>>, vector<1x512x256xbf16>
    %30 = vector.shape_cast %29 : vector<1x512x256xbf16> to vector<512x256xbf16>
    %cst_10 = arith.constant dense<0.000000e+00> : vector<16x256xf32>
    %31 = tpu.matmul %25, %30, %cst_10 {dimension_numbers = #tpu.dot_dimension_numbers<[1], [0], [0], [1], [0, 0, 1, 1], [], []>} : vector<16x512xbf16>, vector<512x256xbf16>, vector<16x256xf32> -> vector<16x256xf32>
    %c2 = arith.constant 2 : index
    %c0_11 = arith.constant 0 : index
    %c0_12 = arith.constant 0 : index
    %32 = vector.load %arg1[%c2, %c0_11, %c0_12] : memref<3x512x256xbf16, #tpu.memory_space<vmem>>, vector<1x512x256xbf16>
    %33 = vector.shape_cast %32 : vector<1x512x256xbf16> to vector<512x256xbf16>
    %cst_13 = arith.constant dense<0.000000e+00> : vector<16x256xf32>
    %34 = tpu.matmul %25, %33, %cst_13 {dimension_numbers = #tpu.dot_dimension_numbers<[1], [0], [0], [1], [0, 0, 1, 1], [], []>} : vector<16x512xbf16>, vector<512x256xbf16>, vector<16x256xf32> -> vector<16x256xf32>
    %c1_i32_14 = arith.constant 1 : i32
    %35 = tpu.dynamic_rotate %28 by %c1_i32_14 dim 0 : vector<16x256xf32>, i32 -> vector<16x256xf32>
    %36 = vector.broadcast %20 : vector<16x1xf32> to vector<16x256xf32>
    %37 = arith.mulf %35, %36 : vector<16x256xf32>
    %c15_i32 = arith.constant 15 : i32
    %38 = tpu.dynamic_rotate %34 by %c15_i32 dim 0 : vector<16x256xf32>, i32 -> vector<16x256xf32>
    %39 = vector.broadcast %24 : vector<16x1xf32> to vector<16x256xf32>
    %40 = arith.mulf %38, %39 : vector<16x256xf32>
    %41 = arith.addf %31, %37 : vector<16x256xf32>
    %42 = arith.addf %41, %40 : vector<16x256xf32>
    %c0_15 = arith.constant 0 : index
    %c0_16 = arith.constant 0 : index
    %43 = vector.load %arg2[%c0_15, %c0_16] : memref<1x256xf32, #tpu.memory_space<vmem>>, vector<1x256xf32>
    %44 = vector.broadcast %43 : vector<1x256xf32> to vector<16x256xf32>
    %45 = arith.addf %42, %44 : vector<16x256xf32>
    %cst_17 = arith.constant dense<0.000000e+00> : vector<16xf32>
    %46 = vector.multi_reduction <add>, %45, %cst_17 [1] : vector<16x256xf32> to vector<16xf32>
    %47 = vector.shape_cast %46 : vector<16xf32> to vector<16x1xf32>
    %cst_18 = arith.constant 2.560000e+02 : f32
    %48 = vector.broadcast %cst_18 : f32 to vector<16x1xf32>
    %49 = arith.divf %47, %48 : vector<16x1xf32>
    %50 = vector.broadcast %49 : vector<16x1xf32> to vector<16x256xf32>
    %51 = arith.subf %45, %50 : vector<16x256xf32>
    %52 = arith.mulf %51, %51 : vector<16x256xf32>
    %cst_19 = arith.constant dense<0.000000e+00> : vector<16xf32>
    %53 = vector.multi_reduction <add>, %52, %cst_19 [1] : vector<16x256xf32> to vector<16xf32>
    %54 = vector.shape_cast %53 : vector<16xf32> to vector<16x1xf32>
    %cst_20 = arith.constant 2.560000e+02 : f32
    %55 = vector.broadcast %cst_20 : f32 to vector<16x1xf32>
    %56 = arith.divf %54, %55 : vector<16x1xf32>
    %57 = vector.broadcast %49 : vector<16x1xf32> to vector<16x256xf32>
    %58 = arith.subf %45, %57 : vector<16x256xf32>
    %cst_21 = arith.constant 9.99999974E-6 : f32
    %59 = vector.broadcast %cst_21 : f32 to vector<16x1xf32>
    %60 = arith.addf %56, %59 : vector<16x1xf32>
    %61 = math.rsqrt %60 : vector<16x1xf32>
    %62 = vector.broadcast %61 : vector<16x1xf32> to vector<16x256xf32>
    %63 = arith.mulf %58, %62 : vector<16x256xf32>
    %c0_22 = arith.constant 0 : index
    %c0_23 = arith.constant 0 : index
    %64 = vector.load %arg3[%c0_22, %c0_23] : memref<1x256xf32, #tpu.memory_space<vmem>>, vector<1x256xf32>
    %65 = vector.broadcast %64 : vector<1x256xf32> to vector<16x256xf32>
    %66 = arith.mulf %63, %65 : vector<16x256xf32>
    %c0_24 = arith.constant 0 : index
    %c0_25 = arith.constant 0 : index
    %67 = vector.load %arg4[%c0_24, %c0_25] : memref<1x256xf32, #tpu.memory_space<vmem>>, vector<1x256xf32>
    %68 = vector.broadcast %67 : vector<1x256xf32> to vector<16x256xf32>
    %69 = arith.addf %66, %68 : vector<16x256xf32>
    %cst_26 = arith.constant 0.000000e+00 : f32
    %70 = vector.broadcast %cst_26 : f32 to vector<16x256xf32>
    %71 = arith.maximumf %69, %70 : vector<16x256xf32>
    %72 = arith.truncf %71 : vector<16x256xf32> to vector<16x256xbf16>
    %c0_27 = arith.constant 0 : index
    %c0_28 = arith.constant 0 : index
    %c0_29 = arith.constant 0 : index
    %73 = vector.load %arg5[%c0_27, %c0_28, %c0_29] : memref<3x256x256xbf16, #tpu.memory_space<vmem>>, vector<1x256x256xbf16>
    %74 = vector.shape_cast %73 : vector<1x256x256xbf16> to vector<256x256xbf16>
    %cst_30 = arith.constant dense<0.000000e+00> : vector<16x256xf32>
    %75 = tpu.matmul %72, %74, %cst_30 {dimension_numbers = #tpu.dot_dimension_numbers<[1], [0], [0], [1], [0, 0, 1, 1], [], []>} : vector<16x256xbf16>, vector<256x256xbf16>, vector<16x256xf32> -> vector<16x256xf32>
    %c1_31 = arith.constant 1 : index
    %c0_32 = arith.constant 0 : index
    %c0_33 = arith.constant 0 : index
    %76 = vector.load %arg5[%c1_31, %c0_32, %c0_33] : memref<3x256x256xbf16, #tpu.memory_space<vmem>>, vector<1x256x256xbf16>
    %77 = vector.shape_cast %76 : vector<1x256x256xbf16> to vector<256x256xbf16>
    %cst_34 = arith.constant dense<0.000000e+00> : vector<16x256xf32>
    %78 = tpu.matmul %72, %77, %cst_34 {dimension_numbers = #tpu.dot_dimension_numbers<[1], [0], [0], [1], [0, 0, 1, 1], [], []>} : vector<16x256xbf16>, vector<256x256xbf16>, vector<16x256xf32> -> vector<16x256xf32>
    %c2_35 = arith.constant 2 : index
    %c0_36 = arith.constant 0 : index
    %c0_37 = arith.constant 0 : index
    %79 = vector.load %arg5[%c2_35, %c0_36, %c0_37] : memref<3x256x256xbf16, #tpu.memory_space<vmem>>, vector<1x256x256xbf16>
    %80 = vector.shape_cast %79 : vector<1x256x256xbf16> to vector<256x256xbf16>
    %cst_38 = arith.constant dense<0.000000e+00> : vector<16x256xf32>
    %81 = tpu.matmul %72, %80, %cst_38 {dimension_numbers = #tpu.dot_dimension_numbers<[1], [0], [0], [1], [0, 0, 1, 1], [], []>} : vector<16x256xbf16>, vector<256x256xbf16>, vector<16x256xf32> -> vector<16x256xf32>
    %c1_i32_39 = arith.constant 1 : i32
    %82 = tpu.dynamic_rotate %75 by %c1_i32_39 dim 0 : vector<16x256xf32>, i32 -> vector<16x256xf32>
    %83 = vector.broadcast %20 : vector<16x1xf32> to vector<16x256xf32>
    %84 = arith.mulf %82, %83 : vector<16x256xf32>
    %c15_i32_40 = arith.constant 15 : i32
    %85 = tpu.dynamic_rotate %81 by %c15_i32_40 dim 0 : vector<16x256xf32>, i32 -> vector<16x256xf32>
    %86 = vector.broadcast %24 : vector<16x1xf32> to vector<16x256xf32>
    %87 = arith.mulf %85, %86 : vector<16x256xf32>
    %88 = arith.addf %78, %84 : vector<16x256xf32>
    %89 = arith.addf %88, %87 : vector<16x256xf32>
    %c0_41 = arith.constant 0 : index
    %c0_42 = arith.constant 0 : index
    %90 = vector.load %arg6[%c0_41, %c0_42] : memref<1x256xf32, #tpu.memory_space<vmem>>, vector<1x256xf32>
    %91 = vector.broadcast %90 : vector<1x256xf32> to vector<16x256xf32>
    %92 = arith.addf %89, %91 : vector<16x256xf32>
    %cst_43 = arith.constant dense<0.000000e+00> : vector<16xf32>
    %93 = vector.multi_reduction <add>, %92, %cst_43 [1] : vector<16x256xf32> to vector<16xf32>
    %94 = vector.shape_cast %93 : vector<16xf32> to vector<16x1xf32>
    %cst_44 = arith.constant 2.560000e+02 : f32
    %95 = vector.broadcast %cst_44 : f32 to vector<16x1xf32>
    %96 = arith.divf %94, %95 : vector<16x1xf32>
    %97 = vector.broadcast %96 : vector<16x1xf32> to vector<16x256xf32>
    %98 = arith.subf %92, %97 : vector<16x256xf32>
    %99 = arith.mulf %98, %98 : vector<16x256xf32>
    %cst_45 = arith.constant dense<0.000000e+00> : vector<16xf32>
    %100 = vector.multi_reduction <add>, %99, %cst_45 [1] : vector<16x256xf32> to vector<16xf32>
    %101 = vector.shape_cast %100 : vector<16xf32> to vector<16x1xf32>
    %cst_46 = arith.constant 2.560000e+02 : f32
    %102 = vector.broadcast %cst_46 : f32 to vector<16x1xf32>
    %103 = arith.divf %101, %102 : vector<16x1xf32>
    %104 = vector.broadcast %96 : vector<16x1xf32> to vector<16x256xf32>
    %105 = arith.subf %92, %104 : vector<16x256xf32>
    %cst_47 = arith.constant 9.99999974E-6 : f32
    %106 = vector.broadcast %cst_47 : f32 to vector<16x1xf32>
    %107 = arith.addf %103, %106 : vector<16x1xf32>
    %108 = math.rsqrt %107 : vector<16x1xf32>
    %109 = vector.broadcast %108 : vector<16x1xf32> to vector<16x256xf32>
    %110 = arith.mulf %105, %109 : vector<16x256xf32>
    %c0_48 = arith.constant 0 : index
    %c0_49 = arith.constant 0 : index
    %111 = vector.load %arg7[%c0_48, %c0_49] : memref<1x256xf32, #tpu.memory_space<vmem>>, vector<1x256xf32>
    %112 = vector.broadcast %111 : vector<1x256xf32> to vector<16x256xf32>
    %113 = arith.mulf %110, %112 : vector<16x256xf32>
    %c0_50 = arith.constant 0 : index
    %c0_51 = arith.constant 0 : index
    %114 = vector.load %arg8[%c0_50, %c0_51] : memref<1x256xf32, #tpu.memory_space<vmem>>, vector<1x256xf32>
    %115 = vector.broadcast %114 : vector<1x256xf32> to vector<16x256xf32>
    %116 = arith.addf %113, %115 : vector<16x256xf32>
    %cst_52 = arith.constant 0.000000e+00 : f32
    %117 = vector.broadcast %cst_52 : f32 to vector<16x256xf32>
    %118 = arith.maximumf %116, %117 : vector<16x256xf32>
    %119 = vector.shape_cast %118 : vector<16x256xf32> to vector<2x8x256xf32>
    %c0_53 = arith.constant 0 : index
    %c0_54 = arith.constant 0 : index
    %120 = vector.load %arg9[%c0_53, %c0_54] : memref<1x256xf32, #tpu.memory_space<vmem>>, vector<1x256xf32>
    %121 = vector.shape_cast %120 : vector<1x256xf32> to vector<1x1x256xf32>
    %122 = vector.broadcast %121 : vector<1x1x256xf32> to vector<2x8x256xf32>
    %123 = arith.mulf %119, %122 : vector<2x8x256xf32>
    %cst_55 = arith.constant dense<0.000000e+00> : vector<2x8xf32>
    %124 = vector.multi_reduction <add>, %123, %cst_55 [2] : vector<2x8x256xf32> to vector<2x8xf32>
    %c0_56 = arith.constant 0 : index
    %c0_57 = arith.constant 0 : index
    %125 = vector.load %arg10[%c0_56, %c0_57] : memref<1x1xf32, #tpu.memory_space<vmem>>, vector<1x1xf32>
    %126 = vector.broadcast %125 : vector<1x1xf32> to vector<2x8xf32>
    %127 = arith.addf %124, %126 : vector<2x8xf32>
    %cst_58 = arith.constant 0.000000e+00 : f32
    %128 = vector.broadcast %cst_58 : f32 to vector<2x8xf32>
    %129 = arith.maximumf %127, %128 : vector<2x8xf32>
    %c0_59 = arith.constant 0 : index
    %c0_60 = arith.constant 0 : index
    %130 = vector.load %arg11[%c0_59, %c0_60] : memref<2x8xf32, #tpu.memory_space<vmem>>, vector<2x8xf32>
    tpu.vector_store %arg11[%c0_59, %c0_60], %129 {strides = array<i32>} : memref<2x8xf32, #tpu.memory_space<vmem>>, vector<2x8xf32>,
    return
  }
}

</mosaic_0001>

<bundles_post_ra>
// kernel: tpu_custom_call.1
= control target key start
LH: loop header
LB: loop body
LE: loop exit
PB: predicated region body
PF: predicated region fallthrough
CT: control target
= control target key end

     0   :  { %s3654_s0 = inlined_call_operand.hbm [shape: bf16[16,512], index: 0, kind: input, shape index: {}]   ;;  %s3655_s1 = inlined_call_operand.hbm [shape: bf16[3,512,256], index: 1, kind: input, shape index: {}]   ;;  %s3656_s2 = inlined_call_operand.vmem [shape: f32[1,256], index: 2, kind: input, shape index: {}]   ;;  %s3657_s3 = inlined_call_operand.vmem [shape: f32[1,256], index: 3, kind: input, shape index: {}]   ;;  %s3658_s4 = inlined_call_operand.vmem [shape: f32[1,256], index: 4, kind: input, shape index: {}]   ;;  %s3659_s5 = inlined_call_operand.hbm [shape: bf16[3,256,256], index: 5, kind: input, shape index: {}]   ;;  %s3660_s6 = inlined_call_operand.vmem [shape: f32[1,256], index: 6, kind: input, shape index: {}]   ;;  %s3661_s7 = inlined_call_operand.vmem [shape: f32[1,256], index: 7, kind: input, shape index: {}]   ;;  %s3662_s8 = inlined_call_operand.vmem [shape: f32[1,256], index: 8, kind: input, shape index: {}]   ;;  %s3663_s9 = inlined_call_operand.vmem [shape: f32[1,256], index: 9, kind: input, shape index: {}]   ;;  %s3664_s10 = inlined_call_operand.<no memory space> [shape: f32[1,1], index: 10, kind: input, shape index: {}]   ;;  %s3665_s11 = inlined_call_operand.hbm [shape: f32[2,8], index: 11, kind: output, shape index: {}]  }
   0x1   :  { %v16_v0 = vstv %s3664_s10 }
   0x2   :  { %17 = vst [vmem:[#allocation2] sm:$0x1] %v16_v0 }
   0x3   :  { %18 = vsyncpa [#allocation4], 0 }
   0x4   :  { %19 = vsyncpa [#allocation7], 0 }
   0x5   :  { %20 = vsyncpa [#allocation5], 0  ;;  %s3402_s19 = smov [#allocation6]  }
   0x6   :  { %s38_s20 = sshll.u32 %s3402_s19, 4  ;;  %s39_s20 = int_to_ptr.vmem [resolvable:$true] %s38_s20 }
   0x7   :  { %s3324_s21 = scalar_lea.vmem %s39_s20, 24576  ;;  %p3329_p1 = scmp.lt.s32.totalorder %s39_s20, %s39_s20 }
   0x8   :  { %p3325_p0 = scmp.ne.s32.totalorder %s39_s20, %s3324_s21  ;;  %p3330_p2 = scmp.lt.s32.totalorder %s3324_s21, %s3324_s21 }
   0xa   :  { %p3331_p3 = por %p3330_p2, %p3329_p1 }
   0xc   :  { %p3332_p4 = pnand %p3331_p3, %p3325_p0 }
   0xe   :  { %3335 = shalt.err (!%p3332_p4)
}
   0xf   :  { %s3403_s22 = smov 128   ;;  %s3404_s23 = smov 8  }
  0x10   :  { %44 = dma.hbm_to_vmem [thread:$0]  %s3655_s1, 24576, %s39_s20, [#allocation7], %s3403_s22, %s3403_s22, %s3404_s23  }
  0x11   :  { %s3405_s10 = smov [#allocation3]  }
  0x12   :  { %s26_s26 = sshll.u32 %s3405_s10, 4  ;;  %s27_s26 = int_to_ptr.vmem [resolvable:$true] %s26_s26 }
  0x13   :  { %s3344_s27 = scalar_lea.vmem %s27_s26, 512  ;;  %p3349_p6 = scmp.lt.s32.totalorder %s27_s26, %s27_s26 }
  0x14   :  { %p3345_p5 = scmp.ne.s32.totalorder %s27_s26, %s3344_s27  ;;  %p3350_p7 = scmp.lt.s32.totalorder %s3344_s27, %s3344_s27 }
  0x16   :  { %p3351_p8 = por %p3350_p7, %p3349_p6 }
  0x18   :  { %p3352_p9 = pnand %p3351_p8, %p3345_p5 }
  0x1a   :  { %3355 = shalt.err (!%p3352_p9)
}
  0x1b   :  { %s3406_s28 = smov 256   ;;  %s3407_s29 = smov 16  }
  0x1c   :  { %32 = dma.hbm_to_vmem [thread:$0]  %s3654_s0, 512, %s27_s26, [#allocation4], %s3406_s28, %s3406_s28, %s3407_s29  }
  0x1d   :  { %s3408_s13 = smov [#allocation8]  }
  0x1e   :  { %s56_s14 = sshll.u32 %s3408_s13, 4  ;;  %s57_s14 = int_to_ptr.vmem [resolvable:$true] %s56_s14 }
  0x1f   :  { %s3364_s1 = scalar_lea.vmem %s57_s14, 12288  ;;  %p3369_p11 = scmp.lt.s32.totalorder %s57_s14, %s57_s14 }
  0x20   :  { %p3365_p10 = scmp.ne.s32.totalorder %s57_s14, %s3364_s1  ;;  %p3370_p12 = scmp.lt.s32.totalorder %s3364_s1, %s3364_s1 }
  0x22   :  { %p3371_p13 = por %p3370_p12, %p3369_p11 }
  0x24   :  { %p3372_p0 = pnand %p3371_p13, %p3365_p10 }
  0x26   :  { %3375 = shalt.err (!%p3372_p0)
}
  0x27   :  { %62 = dma.hbm_to_vmem [thread:$0]  %s3659_s5, 12288, %s57_s14, [#allocation7], %s3403_s22, %s3403_s22, %s3404_s23  }
  0x28   :  { %3396 = dma.done.wait [#allocation4], 512  }
  0x29   :  { %3397 = vsyncadd [#allocation4], 4294966784 }
  0x2a   :  { %3398 = dma.done.wait [#allocation7], 36864  }
  0x2b   :  { %3399 = vsyncadd [#allocation7], 4294930432  ;;  %v2870_v1 = vld [vmem:[#allocation6 + $0x74] ss:$8 sps:$4 sm:$0xff]   ;;  %v2874_v3 = vld [vmem:[#allocation6 + $0x70] ss:$8 sps:$4 sm:$0xff]  }
  0x2c   :  { %v2872_v2 = vld [vmem:[#allocation6 + $0x174] ss:$8 sps:$4 sm:$0xff]   ;;  %529 = vmatprep.subr.bf16.mxu0 %v2870_v1  ;;  %v2875_v4 = vld [vmem:[#allocation6 + $0x170] ss:$8 sps:$4 sm:$0xff]   ;;  %v2876_v5 = vld [vmem:[#allocation6 + $0x64] ss:$8 sps:$4 sm:$0xff]  }
  0x2d   :  { %572 = vmatprep.subr.bf16.mxu1 %v2872_v2  ;;  %530 = vmatpush1.bf16.msra.mxu0 %v2874_v3  ;;  %v2878_v6 = vld [vmem:[#allocation6 + $0x164] ss:$8 sps:$4 sm:$0xff]   ;;  %v2880_v7 = vld [vmem:[#allocation6 + $0x60] ss:$8 sps:$4 sm:$0xff]   ;;  %v2882_v9 = vld [vmem:[#allocation6 + $0x54] ss:$8 sps:$4 sm:$0xff]  }
  0x2e   :  { %573 = vmatpush1.bf16.msra.mxu1 %v2875_v4  ;;  %531 = vmatprep.subr.bf16.mxu0 %v2876_v5  ;;  %v2881_v8 = vld [vmem:[#allocation6 + $0x160] ss:$8 sps:$4 sm:$0xff]   ;;  %v2884_v10 = vld [vmem:[#allocation6 + $0x154] ss:$8 sps:$4 sm:$0xff]   ;;  %v2886_v11 = vld [vmem:[#allocation6 + $0x50] ss:$8 sps:$4 sm:$0xff]  }
  0x2f   :  { %574 = vmatprep.subr.bf16.mxu1 %v2878_v6  ;;  %v2887_v12 = vld [vmem:[#allocation6 + $0x150] ss:$8 sps:$4 sm:$0xff]   ;;  %v2888_v13 = vld [vmem:[#allocation6 + $0x44] ss:$8 sps:$4 sm:$0xff]   ;;  %v2892_v15 = vld [vmem:[#allocation6 + $0x40] ss:$8 sps:$4 sm:$0xff]  }
  0x30   :  { %v2890_v14 = vld [vmem:[#allocation6 + $0x144] ss:$8 sps:$4 sm:$0xff]   ;;  %v2893_v16 = vld [vmem:[#allocation6 + $0x140] ss:$8 sps:$4 sm:$0xff]   ;;  %v2894_v17 = vld [vmem:[#allocation6 + $0x34] ss:$8 sps:$4 sm:$0xff]  }
  0x31   :  { %532 = vmatpush1.bf16.msra.mxu0 %v2880_v7  ;;  %v2896_v18 = vld [vmem:[#allocation6 + $0x134] ss:$8 sps:$4 sm:$0xff]   ;;  %v2898_v19 = vld [vmem:[#allocation6 + $0x30] ss:$8 sps:$4 sm:$0xff]   ;;  %v2900_v21 = vld [vmem:[#allocation6 + $0x24] ss:$8 sps:$4 sm:$0xff]  }
  0x32   :  { %575 = vmatpush1.bf16.msra.mxu1 %v2881_v8  ;;  %533 = vmatprep.subr.bf16.mxu0 %v2882_v9  ;;  %v2899_v20 = vld [vmem:[#allocation6 + $0x130] ss:$8 sps:$4 sm:$0xff]   ;;  %v2902_v22 = vld [vmem:[#allocation6 + $0x124] ss:$8 sps:$4 sm:$0xff]   ;;  %v2904_v23 = vld [vmem:[#allocation6 + $0x20] ss:$8 sps:$4 sm:$0xff]  }
  0x33   :  { %576 = vmatprep.subr.bf16.mxu1 %v2884_v10  ;;  %v2905_v24 = vld [vmem:[#allocation6 + $0x120] ss:$8 sps:$4 sm:$0xff]   ;;  %v2906_v25 = vld [vmem:[#allocation6 + $0x14] ss:$8 sps:$4 sm:$0xff]   ;;  %v2910_v27 = vld [vmem:[#allocation6 + $0x10] ss:$8 sps:$4 sm:$0xff]  }
  0x34   :  { %v2908_v26 = vld [vmem:[#allocation6 + $0x114] ss:$8 sps:$4 sm:$0xff]   ;;  %v2911_v28 = vld [vmem:[#allocation6 + $0x110] ss:$8 sps:$4 sm:$0xff]   ;;  %v2912_v29 = vld [vmem:[#allocation6 + $0x4] ss:$8 sps:$4 sm:$0xff]  }
  0x35   :  { %534 = vmatpush1.bf16.msra.mxu0 %v2886_v11  ;;  %v2914_v30 = vld [vmem:[#allocation6 + $0x104] ss:$8 sps:$4 sm:$0xff]   ;;  %v2916_v31 = vld [vmem:[#allocation6] ss:$8 sps:$4 sm:$0xff]   ;;  %v2918_v33 = vld [vmem:[#allocation6 + $0xf4] ss:$8 sps:$4 sm:$0xff]  }
  0x36   :  { %577 = vmatpush1.bf16.msra.mxu1 %v2887_v12  ;;  %535 = vmatprep.subr.bf16.mxu0 %v2888_v13  ;;  %v2917_v32 = vld [vmem:[#allocation6 + $0x100] ss:$8 sps:$4 sm:$0xff]   ;;  %v2920_v34 = vld [vmem:[#allocation6 + $0x1f4] ss:$8 sps:$4 sm:$0xff]   ;;  %v2922_v35 = vld [vmem:[#allocation6 + $0xf0] ss:$8 sps:$4 sm:$0xff]  }
  0x37   :  { %578 = vmatprep.subr.bf16.mxu1 %v2890_v14  ;;  %v2923_v36 = vld [vmem:[#allocation6 + $0x1f0] ss:$8 sps:$4 sm:$0xff]   ;;  %v2924_v37 = vld [vmem:[#allocation6 + $0xe4] ss:$8 sps:$4 sm:$0xff]   ;;  %v2928_v39 = vld [vmem:[#allocation6 + $0xe0] ss:$8 sps:$4 sm:$0xff]  }
  0x38   :  { %v2926_v38 = vld [vmem:[#allocation6 + $0x1e4] ss:$8 sps:$4 sm:$0xff]   ;;  %v2929_v40 = vld [vmem:[#allocation6 + $0x1e0] ss:$8 sps:$4 sm:$0xff]   ;;  %v2930_v41 = vld [vmem:[#allocation6 + $0xd4] ss:$8 sps:$4 sm:$0xff]  }
  0x39   :  { %536 = vmatpush1.bf16.msra.mxu0 %v2892_v15  ;;  %v2932_v42 = vld [vmem:[#allocation6 + $0x1d4] ss:$8 sps:$4 sm:$0xff]   ;;  %v2934_v43 = vld [vmem:[#allocation6 + $0xd0] ss:$8 sps:$4 sm:$0xff]   ;;  %v2936_v45 = vld [vmem:[#allocation6 + $0xc4] ss:$8 sps:$4 sm:$0xff]  }
  0x3a   :  { %579 = vmatpush1.bf16.msra.mxu1 %v2893_v16  ;;  %537 = vmatprep.subr.bf16.mxu0 %v2894_v17  ;;  %v2935_v44 = vld [vmem:[#allocation6 + $0x1d0] ss:$8 sps:$4 sm:$0xff]   ;;  %v2938_v46 = vld [vmem:[#allocation6 + $0x1c4] ss:$8 sps:$4 sm:$0xff]   ;;  %v2940_v47 = vld [vmem:[#allocation6 + $0xc0] ss:$8 sps:$4 sm:$0xff]  }
  0x3b   :  { %580 = vmatprep.subr.bf16.mxu1 %v2896_v18  ;;  %v2941_v48 = vld [vmem:[#allocation6 + $0x1c0] ss:$8 sps:$4 sm:$0xff]   ;;  %v3484_v49 = vld [vmem:[#allocation3 + $0x4] ss:$16 sps:$4 sm:$0xff]   ;;  %v3486_v51 = vld [vmem:[#allocation3 + $0xc] ss:$16 sps:$4 sm:$0xff]  }
  0x3c   :  { %v2942_v50 = vld [vmem:[#allocation6 + $0xb4] ss:$8 sps:$4 sm:$0xff]   ;;  %561 = vmatprep.mubr.bf16.mxu0 %v3484_v49  ;;  %604 = vmatprep.mubr.bf16.mxu1 %v3486_v51  ;;  %v2946_v53 = vld [vmem:[#allocation6 + $0xb0] ss:$8 sps:$4 sm:$0xff]   ;;  %v2948_v55 = vld [vmem:[#allocation6 + $0xa4] ss:$8 sps:$4 sm:$0xff]  }
  0x3d   :  { %538 = vmatpush1.bf16.msra.mxu0 %v2898_v19  ;;  %v2944_v52 = vld [vmem:[#allocation6 + $0x1b4] ss:$8 sps:$4 sm:$0xff]   ;;  %v2947_v54 = vld [vmem:[#allocation6 + $0x1b0] ss:$8 sps:$4 sm:$0xff]   ;;  %v2950_v56 = vld [vmem:[#allocation6 + $0x1a4] ss:$8 sps:$4 sm:$0xff]  }
  0x3e   :  { %581 = vmatpush1.bf16.msra.mxu1 %v2899_v20  ;;  %539 = vmatprep.subr.bf16.mxu0 %v2900_v21  ;;  %v2952_v57 = vld [vmem:[#allocation6 + $0xa0] ss:$8 sps:$4 sm:$0xff]   ;;  %v2954_v59 = vld [vmem:[#allocation6 + $0x94] ss:$8 sps:$4 sm:$0xff]   ;;  %v2958_v61 = vld [vmem:[#allocation6 + $0x90] ss:$8 sps:$4 sm:$0xff]  }
  0x3f   :  { %582 = vmatprep.subr.bf16.mxu1 %v2902_v22  ;;  %v2953_v58 = vld [vmem:[#allocation6 + $0x1a0] ss:$8 sps:$4 sm:$0xff]   ;;  %v2956_v60 = vld [vmem:[#allocation6 + $0x194] ss:$8 sps:$4 sm:$0xff]   ;;  %v2959_v62 = vld [vmem:[#allocation6 + $0x190] ss:$8 sps:$4 sm:$0xff]  }
  0x40   :  { %v2960_v63 = vld [vmem:[#allocation6 + $0x84] ss:$8 sps:$4 sm:$0xff]   ;;  %v2964_v1 = vld [vmem:[#allocation6 + $0x80] ss:$8 sps:$4 sm:$0xff]   ;;  %v2974_v3 = vld [vmem:[#allocation6 + $0x474] ss:$8 sps:$4 sm:$0xff]  }
  0x41   :  { %540 = vmatpush1.bf16.msra.mxu0 %v2904_v23  ;;  %v2962_v0 = vld [vmem:[#allocation6 + $0x184] ss:$8 sps:$4 sm:$0xff]   ;;  %v2965_v2 = vld [vmem:[#allocation6 + $0x180] ss:$8 sps:$4 sm:$0xff]   ;;  %v2977_v4 = vld [vmem:[#allocation6 + $0x574] ss:$8 sps:$4 sm:$0xff]  }
  0x42   :  { %583 = vmatpush1.bf16.msra.mxu1 %v2905_v24  ;;  %541 = vmatprep.subr.bf16.mxu0 %v2906_v25  ;;  %v3490_v5 = vld [vmem:[#allocation3] ss:$16 sps:$4 sm:$0xff]   ;;  %v3492_v6 = vld [vmem:[#allocation3 + $0x8] ss:$16 sps:$4 sm:$0xff]   ;;  %v2980_v9 = vld [vmem:[#allocation6 + $0x464] ss:$8 sps:$4 sm:$0xff]  }
  0x43   :  { %584 = vmatprep.subr.bf16.mxu1 %v2908_v26  ;;  %v2972_v7 = vld [vmem:[#allocation6 + $0x470] ss:$8 sps:$4 sm:$0xff]   ;;  %v2983_v10 = vld [vmem:[#allocation6 + $0x564] ss:$8 sps:$4 sm:$0xff]   ;;  %v2978_v11 = vld [vmem:[#allocation6 + $0x460] ss:$8 sps:$4 sm:$0xff]  }
  0x44   :  { %v2975_v8 = vld [vmem:[#allocation6 + $0x570] ss:$8 sps:$4 sm:$0xff]   ;;  %v2981_v12 = vld [vmem:[#allocation6 + $0x560] ss:$8 sps:$4 sm:$0xff]   ;;  %v2986_v13 = vld [vmem:[#allocation6 + $0x454] ss:$8 sps:$4 sm:$0xff]  }
  0x45   :  { %542 = vmatpush1.bf16.msra.mxu0 %v2910_v27  ;;  %v2989_v14 = vld [vmem:[#allocation6 + $0x554] ss:$8 sps:$4 sm:$0xff]   ;;  %v2984_v15 = vld [vmem:[#allocation6 + $0x450] ss:$8 sps:$4 sm:$0xff]   ;;  %v2992_v17 = vld [vmem:[#allocation6 + $0x444] ss:$8 sps:$4 sm:$0xff]  }
  0x46   :  { %585 = vmatpush1.bf16.msra.mxu1 %v2911_v28  ;;  %543 = vmatprep.subr.bf16.mxu0 %v2912_v29  ;;  %v2987_v16 = vld [vmem:[#allocation6 + $0x550] ss:$8 sps:$4 sm:$0xff]   ;;  %v2995_v18 = vld [vmem:[#allocation6 + $0x544] ss:$8 sps:$4 sm:$0xff]   ;;  %v2990_v19 = vld [vmem:[#allocation6 + $0x440] ss:$8 sps:$4 sm:$0xff]  }
  0x47   :  { %586 = vmatprep.subr.bf16.mxu1 %v2914_v30  ;;  %v2993_v20 = vld [vmem:[#allocation6 + $0x540] ss:$8 sps:$4 sm:$0xff]   ;;  %v2998_v21 = vld [vmem:[#allocation6 + $0x434] ss:$8 sps:$4 sm:$0xff]   ;;  %v2996_v23 = vld [vmem:[#allocation6 + $0x430] ss:$8 sps:$4 sm:$0xff]  }
  0x48   :  { %v3001_v22 = vld [vmem:[#allocation6 + $0x534] ss:$8 sps:$4 sm:$0xff]   ;;  %v2999_v24 = vld [vmem:[#allocation6 + $0x530] ss:$8 sps:$4 sm:$0xff]   ;;  %v3004_v25 = vld [vmem:[#allocation6 + $0x424] ss:$8 sps:$4 sm:$0xff]  }
  0x49   :  { %544 = vmatpush1.bf16.msra.mxu0 %v2916_v31  ;;  %v3007_v26 = vld [vmem:[#allocation6 + $0x524] ss:$8 sps:$4 sm:$0xff]   ;;  %v3002_v27 = vld [vmem:[#allocation6 + $0x420] ss:$8 sps:$4 sm:$0xff]   ;;  %v3010_v29 = vld [vmem:[#allocation6 + $0x414] ss:$8 sps:$4 sm:$0xff]  }
  0x4a   :  { %587 = vmatpush1.bf16.msra.mxu1 %v2917_v32  ;;  %545 = vmatprep.subr.bf16.mxu0 %v2918_v33  ;;  %v3005_v28 = vld [vmem:[#allocation6 + $0x520] ss:$8 sps:$4 sm:$0xff]   ;;  %v3013_v30 = vld [vmem:[#allocation6 + $0x514] ss:$8 sps:$4 sm:$0xff]   ;;  %v3008_v31 = vld [vmem:[#allocation6 + $0x410] ss:$8 sps:$4 sm:$0xff]  }
  0x4b   :  { %588 = vmatprep.subr.bf16.mxu1 %v2920_v34  ;;  %v3011_v32 = vld [vmem:[#allocation6 + $0x510] ss:$8 sps:$4 sm:$0xff]   ;;  %v3016_v33 = vld [vmem:[#allocation6 + $0x404] ss:$8 sps:$4 sm:$0xff]   ;;  %vm2541_vm6 = vcmask 1041409   ;;  %vm2544_vm7 = vcmask 58368  }
  0x4c   :  { %v3019_v34 = vld [vmem:[#allocation6 + $0x504] ss:$8 sps:$4 sm:$0xff]  }
  0x4d   :  { %546 = vmatpush2.bf16.msra.mxu0 %v2922_v35  ;;  %v3014_v35 = vld [vmem:[#allocation6 + $0x400] ss:$8 sps:$4 sm:$0xff]  }
  0x4e   :  { %589 = vmatpush2.bf16.msra.mxu1 %v2923_v36  ;;  %547 = vmatprep.subr.bf16.mxu0 %v2924_v37  ;;  %v3017_v36 = vld [vmem:[#allocation6 + $0x500] ss:$8 sps:$4 sm:$0xff]   ;;  %v3022_v37 = vld [vmem:[#allocation6 + $0x4f4] ss:$8 sps:$4 sm:$0xff]  }
  0x4f   :  { %590 = vmatprep.subr.bf16.mxu1 %v2926_v38  ;;  %v3025_v38 = vld [vmem:[#allocation6 + $0x5f4] ss:$8 sps:$4 sm:$0xff]  }
  0x51   :  { %548 = vmatpush2.bf16.msra.mxu0 %v2928_v39  ;;  %v3020_v39 = vld [vmem:[#allocation6 + $0x4f0] ss:$8 sps:$4 sm:$0xff]  }
  0x52   :  { %591 = vmatpush2.bf16.msra.mxu1 %v2929_v40  ;;  %549 = vmatprep.subr.bf16.mxu0 %v2930_v41  ;;  %v3023_v40 = vld [vmem:[#allocation6 + $0x5f0] ss:$8 sps:$4 sm:$0xff]   ;;  %v3028_v41 = vld [vmem:[#allocation6 + $0x4e4] ss:$8 sps:$4 sm:$0xff]  }
  0x53   :  { %592 = vmatprep.subr.bf16.mxu1 %v2932_v42  ;;  %v3031_v42 = vld [vmem:[#allocation6 + $0x5e4] ss:$8 sps:$4 sm:$0xff]  }
  0x55   :  { %550 = vmatpush2.bf16.msra.mxu0 %v2934_v43  ;;  %v3026_v43 = vld [vmem:[#allocation6 + $0x4e0] ss:$8 sps:$4 sm:$0xff]  }
  0x56   :  { %593 = vmatpush2.bf16.msra.mxu1 %v2935_v44  ;;  %551 = vmatprep.subr.bf16.mxu0 %v2936_v45  ;;  %v3029_v44 = vld [vmem:[#allocation6 + $0x5e0] ss:$8 sps:$4 sm:$0xff]   ;;  %v3034_v45 = vld [vmem:[#allocation6 + $0x4d4] ss:$8 sps:$4 sm:$0xff]  }
  0x57   :  { %594 = vmatprep.subr.bf16.mxu1 %v2938_v46  ;;  %v3037_v46 = vld [vmem:[#allocation6 + $0x5d4] ss:$8 sps:$4 sm:$0xff]  }
  0x59   :  { %552 = vmatpush2.bf16.msra.mxu0 %v2940_v47  ;;  %v3032_v47 = vld [vmem:[#allocation6 + $0x4d0] ss:$8 sps:$4 sm:$0xff]  }
  0x5a   :  { %595 = vmatpush2.bf16.msra.mxu1 %v2941_v48  ;;  %553 = vmatprep.subr.bf16.mxu0 %v2942_v50  ;;  %v3035_v48 = vld [vmem:[#allocation6 + $0x5d0] ss:$8 sps:$4 sm:$0xff]   ;;  %v3040_v50 = vld [vmem:[#allocation6 + $0x4c4] ss:$8 sps:$4 sm:$0xff]  }
  0x5b   :  { %596 = vmatprep.subr.bf16.mxu1 %v2944_v52  ;;  %v3043_v52 = vld [vmem:[#allocation6 + $0x5c4] ss:$8 sps:$4 sm:$0xff]  }
  0x5d   :  { %554 = vmatpush2.bf16.msra.mxu0 %v2946_v53  ;;  %v3038_v53 = vld [vmem:[#allocation6 + $0x4c0] ss:$8 sps:$4 sm:$0xff]  }
  0x5e   :  { %597 = vmatpush2.bf16.msra.mxu1 %v2947_v54  ;;  %555 = vmatprep.subr.bf16.mxu0 %v2948_v55  ;;  %v3041_v54 = vld [vmem:[#allocation6 + $0x5c0] ss:$8 sps:$4 sm:$0xff]   ;;  %v3046_v55 = vld [vmem:[#allocation6 + $0x4b4] ss:$8 sps:$4 sm:$0xff]  }
  0x5f   :  { %598 = vmatprep.subr.bf16.mxu1 %v2950_v56  ;;  %v3049_v56 = vld [vmem:[#allocation6 + $0x5b4] ss:$8 sps:$4 sm:$0xff]  }
  0x61   :  { %556 = vmatpush2.bf16.msra.mxu0 %v2952_v57  ;;  %v3044_v57 = vld [vmem:[#allocation6 + $0x4b0] ss:$8 sps:$4 sm:$0xff]  }
  0x62   :  { %599 = vmatpush2.bf16.msra.mxu1 %v2953_v58  ;;  %557 = vmatprep.subr.bf16.mxu0 %v2954_v59  ;;  %v3047_v58 = vld [vmem:[#allocation6 + $0x5b0] ss:$8 sps:$4 sm:$0xff]   ;;  %v3052_v59 = vld [vmem:[#allocation6 + $0x4a4] ss:$8 sps:$4 sm:$0xff]  }
  0x63   :  { %600 = vmatprep.subr.bf16.mxu1 %v2956_v60  ;;  %v3055_v60 = vld [vmem:[#allocation6 + $0x5a4] ss:$8 sps:$4 sm:$0xff]  }
  0x65   :  { %558 = vmatpush2.bf16.msra.mxu0 %v2958_v61  ;;  %v3050_v61 = vld [vmem:[#allocation6 + $0x4a0] ss:$8 sps:$4 sm:$0xff]  }
  0x66   :  { %601 = vmatpush2.bf16.msra.mxu1 %v2959_v62  ;;  %559 = vmatprep.subr.bf16.mxu0 %v2960_v63  ;;  %v3053_v62 = vld [vmem:[#allocation6 + $0x5a0] ss:$8 sps:$4 sm:$0xff]   ;;  %v3058_v63 = vld [vmem:[#allocation6 + $0x494] ss:$8 sps:$4 sm:$0xff]  }
  0x67   :  { %602 = vmatprep.subr.bf16.mxu1 %v2962_v0  ;;  %v3061_v0 = vld [vmem:[#allocation6 + $0x594] ss:$8 sps:$4 sm:$0xff]  }
  0x69   :  { %560 = vmatpush2.bf16.msra.mxu0 %v2964_v1  ;;  %v3056_v1 = vld [vmem:[#allocation6 + $0x490] ss:$8 sps:$4 sm:$0xff]  }
  0x6a   :  { %603 = vmatpush2.bf16.msra.mxu1 %v2965_v2  ;;  %1065 = vmatprep.subr.bf16.mxu0 %v2974_v3  ;;  %v3059_v2 = vld [vmem:[#allocation6 + $0x590] ss:$8 sps:$4 sm:$0xff]   ;;  %v3064_v3 = vld [vmem:[#allocation6 + $0x484] ss:$8 sps:$4 sm:$0xff]  }
  0x6b   :  { %1108 = vmatprep.subr.bf16.mxu1 %v2977_v4  ;;  %v3067_v4 = vld [vmem:[#allocation6 + $0x584] ss:$8 sps:$4 sm:$0xff]  }
  0x6c   :  { %562 = vmatmul.mubr.bf16.vlgmr.msra.gmra.mxu0 %v3490_v5 }
  0x6d   :  { %605 = vmatmul.mubr.bf16.vlgmr.msra.gmra.mxu1 %v3492_v6  ;;  %1066 = vmatpush1.bf16.msra.mxu0 %v2972_v7  ;;  %v3062_v7 = vld [vmem:[#allocation6 + $0x480] ss:$8 sps:$4 sm:$0xff]  }
  0x6e   :  { %1109 = vmatpush1.bf16.msra.mxu1 %v2975_v8  ;;  %1067 = vmatprep.subr.bf16.mxu0 %v2980_v9  ;;  %v3065_v8 = vld [vmem:[#allocation6 + $0x580] ss:$8 sps:$4 sm:$0xff]   ;;  %v3070_v9 = vld [vmem:[#allocation6 + $0x274] ss:$8 sps:$4 sm:$0xff]  }
  0x6f   :  { %1110 = vmatprep.subr.bf16.mxu1 %v2983_v10  ;;  %1097 = vmatprep.mubr.bf16.mxu0 %v3484_v49  ;;  %v3073_v10 = vld [vmem:[#allocation6 + $0x374] ss:$8 sps:$4 sm:$0xff]  }
  0x70   :  { %1140 = vmatprep.mubr.bf16.mxu1 %v3486_v51 }
  0x71   :  { %1068 = vmatpush1.bf16.msra.mxu0 %v2978_v11  ;;  %v3068_v11 = vld [vmem:[#allocation6 + $0x270] ss:$8 sps:$4 sm:$0xff]  }
  0x72   :  { %1111 = vmatpush1.bf16.msra.mxu1 %v2981_v12  ;;  %1069 = vmatprep.subr.bf16.mxu0 %v2986_v13  ;;  %v3071_v12 = vld [vmem:[#allocation6 + $0x370] ss:$8 sps:$4 sm:$0xff]   ;;  %v3076_v13 = vld [vmem:[#allocation6 + $0x264] ss:$8 sps:$4 sm:$0xff]  }
  0x73   :  { %1112 = vmatprep.subr.bf16.mxu1 %v2989_v14  ;;  %v3079_v14 = vld [vmem:[#allocation6 + $0x364] ss:$8 sps:$4 sm:$0xff]  }
  0x75   :  { %1070 = vmatpush1.bf16.msra.mxu0 %v2984_v15  ;;  %v3074_v15 = vld [vmem:[#allocation6 + $0x260] ss:$8 sps:$4 sm:$0xff]  }
  0x76   :  { %1113 = vmatpush1.bf16.msra.mxu1 %v2987_v16  ;;  %1071 = vmatprep.subr.bf16.mxu0 %v2992_v17  ;;  %v3077_v16 = vld [vmem:[#allocation6 + $0x360] ss:$8 sps:$4 sm:$0xff]   ;;  %v3082_v17 = vld [vmem:[#allocation6 + $0x254] ss:$8 sps:$4 sm:$0xff]  }
  0x77   :  { %1114 = vmatprep.subr.bf16.mxu1 %v2995_v18  ;;  %v3085_v18 = vld [vmem:[#allocation6 + $0x354] ss:$8 sps:$4 sm:$0xff]  }
  0x79   :  { %1072 = vmatpush1.bf16.msra.mxu0 %v2990_v19  ;;  %v3080_v19 = vld [vmem:[#allocation6 + $0x250] ss:$8 sps:$4 sm:$0xff]  }
  0x7a   :  { %1115 = vmatpush1.bf16.msra.mxu1 %v2993_v20  ;;  %1073 = vmatprep.subr.bf16.mxu0 %v2998_v21  ;;  %v3083_v20 = vld [vmem:[#allocation6 + $0x350] ss:$8 sps:$4 sm:$0xff]   ;;  %v3088_v21 = vld [vmem:[#allocation6 + $0x244] ss:$8 sps:$4 sm:$0xff]  }
  0x7b   :  { %1116 = vmatprep.subr.bf16.mxu1 %v3001_v22  ;;  %v3091_v22 = vld [vmem:[#allocation6 + $0x344] ss:$8 sps:$4 sm:$0xff]  }
  0x7d   :  { %1074 = vmatpush1.bf16.msra.mxu0 %v2996_v23  ;;  %v3086_v23 = vld [vmem:[#allocation6 + $0x240] ss:$8 sps:$4 sm:$0xff]  }
  0x7e   :  { %1117 = vmatpush1.bf16.msra.mxu1 %v2999_v24  ;;  %1075 = vmatprep.subr.bf16.mxu0 %v3004_v25  ;;  %v3089_v24 = vld [vmem:[#allocation6 + $0x340] ss:$8 sps:$4 sm:$0xff]   ;;  %v3094_v25 = vld [vmem:[#allocation6 + $0x234] ss:$8 sps:$4 sm:$0xff]  }
  0x7f   :  { %1118 = vmatprep.subr.bf16.mxu1 %v3007_v26  ;;  %v3097_v26 = vld [vmem:[#allocation6 + $0x334] ss:$8 sps:$4 sm:$0xff]  }
  0x81   :  { %1076 = vmatpush1.bf16.msra.mxu0 %v3002_v27  ;;  %v3092_v27 = vld [vmem:[#allocation6 + $0x230] ss:$8 sps:$4 sm:$0xff]  }
  0x82   :  { %1119 = vmatpush1.bf16.msra.mxu1 %v3005_v28  ;;  %1077 = vmatprep.subr.bf16.mxu0 %v3010_v29  ;;  %v3095_v28 = vld [vmem:[#allocation6 + $0x330] ss:$8 sps:$4 sm:$0xff]   ;;  %v3100_v29 = vld [vmem:[#allocation6 + $0x224] ss:$8 sps:$4 sm:$0xff]  }
  0x83   :  { %1120 = vmatprep.subr.bf16.mxu1 %v3013_v30  ;;  %v3101_v30 = vld [vmem:[#allocation6 + $0x320] ss:$8 sps:$4 sm:$0xff]  }
  0x85   :  { %1078 = vmatpush1.bf16.msra.mxu0 %v3008_v31  ;;  %v3106_v31 = vld [vmem:[#allocation6 + $0x214] ss:$8 sps:$4 sm:$0xff]  }
  0x86   :  { %1121 = vmatpush1.bf16.msra.mxu1 %v3011_v32  ;;  %1079 = vmatprep.subr.bf16.mxu0 %v3016_v33  ;;  %v3109_v32 = vld [vmem:[#allocation6 + $0x314] ss:$8 sps:$4 sm:$0xff]   ;;  %v3104_v33 = vld [vmem:[#allocation6 + $0x210] ss:$8 sps:$4 sm:$0xff]  }
  0x87   :  { %1122 = vmatprep.subr.bf16.mxu1 %v3019_v34  ;;  %v3107_v34 = vld [vmem:[#allocation6 + $0x310] ss:$8 sps:$4 sm:$0xff]  }
  0x89   :  { %1080 = vmatpush1.bf16.msra.mxu0 %v3014_v35  ;;  %v3112_v35 = vld [vmem:[#allocation6 + $0x204] ss:$8 sps:$4 sm:$0xff]  }
  0x8a   :  { %1123 = vmatpush1.bf16.msra.mxu1 %v3017_v36  ;;  %1081 = vmatprep.subr.bf16.mxu0 %v3022_v37  ;;  %v3115_v36 = vld [vmem:[#allocation6 + $0x304] ss:$8 sps:$4 sm:$0xff]   ;;  %v3110_v37 = vld [vmem:[#allocation6 + $0x200] ss:$8 sps:$4 sm:$0xff]  }
  0x8b   :  { %1124 = vmatprep.subr.bf16.mxu1 %v3025_v38  ;;  %v3113_v38 = vld [vmem:[#allocation6 + $0x300] ss:$8 sps:$4 sm:$0xff]  }
  0x8d   :  { %1082 = vmatpush2.bf16.msra.mxu0 %v3020_v39  ;;  %v3118_v39 = vld [vmem:[#allocation6 + $0x2f4] ss:$8 sps:$4 sm:$0xff]  }
  0x8e   :  { %1125 = vmatpush2.bf16.msra.mxu1 %v3023_v40  ;;  %1083 = vmatprep.subr.bf16.mxu0 %v3028_v41  ;;  %v3121_v40 = vld [vmem:[#allocation6 + $0x3f4] ss:$8 sps:$4 sm:$0xff]   ;;  %v3116_v41 = vld [vmem:[#allocation6 + $0x2f0] ss:$8 sps:$4 sm:$0xff]  }
  0x8f   :  { %1126 = vmatprep.subr.bf16.mxu1 %v3031_v42  ;;  %v3119_v42 = vld [vmem:[#allocation6 + $0x3f0] ss:$8 sps:$4 sm:$0xff]  }
  0x91   :  { %1084 = vmatpush2.bf16.msra.mxu0 %v3026_v43  ;;  %v3124_v43 = vld [vmem:[#allocation6 + $0x2e4] ss:$8 sps:$4 sm:$0xff]  }
  0x92   :  { %1127 = vmatpush2.bf16.msra.mxu1 %v3029_v44  ;;  %1085 = vmatprep.subr.bf16.mxu0 %v3034_v45  ;;  %v3127_v44 = vld [vmem:[#allocation6 + $0x3e4] ss:$8 sps:$4 sm:$0xff]   ;;  %v3122_v45 = vld [vmem:[#allocation6 + $0x2e0] ss:$8 sps:$4 sm:$0xff]  }
  0x93   :  { %1128 = vmatprep.subr.bf16.mxu1 %v3037_v46  ;;  %v3125_v46 = vld [vmem:[#allocation6 + $0x3e0] ss:$8 sps:$4 sm:$0xff]  }
  0x95   :  { %1086 = vmatpush2.bf16.msra.mxu0 %v3032_v47  ;;  %v3130_v47 = vld [vmem:[#allocation6 + $0x2d4] ss:$8 sps:$4 sm:$0xff]  }
  0x96   :  { %1129 = vmatpush2.bf16.msra.mxu1 %v3035_v48  ;;  %1087 = vmatprep.subr.bf16.mxu0 %v3040_v50  ;;  %v3133_v48 = vld [vmem:[#allocation6 + $0x3d4] ss:$8 sps:$4 sm:$0xff]   ;;  %v3128_v50 = vld [vmem:[#allocation6 + $0x2d0] ss:$8 sps:$4 sm:$0xff]  }
  0x97   :  { %1130 = vmatprep.subr.bf16.mxu1 %v3043_v52  ;;  %v3131_v52 = vld [vmem:[#allocation6 + $0x3d0] ss:$8 sps:$4 sm:$0xff]  }
  0x99   :  { %1088 = vmatpush2.bf16.msra.mxu0 %v3038_v53  ;;  %v3136_v53 = vld [vmem:[#allocation6 + $0x2c4] ss:$8 sps:$4 sm:$0xff]  }
  0x9a   :  { %1131 = vmatpush2.bf16.msra.mxu1 %v3041_v54  ;;  %1089 = vmatprep.subr.bf16.mxu0 %v3046_v55  ;;  %v3139_v54 = vld [vmem:[#allocation6 + $0x3c4] ss:$8 sps:$4 sm:$0xff]   ;;  %v3134_v55 = vld [vmem:[#allocation6 + $0x2c0] ss:$8 sps:$4 sm:$0xff]  }
  0x9b   :  { %1132 = vmatprep.subr.bf16.mxu1 %v3049_v56  ;;  %v3137_v56 = vld [vmem:[#allocation6 + $0x3c0] ss:$8 sps:$4 sm:$0xff]  }
  0x9d   :  { %1090 = vmatpush2.bf16.msra.mxu0 %v3044_v57  ;;  %v3142_v57 = vld [vmem:[#allocation6 + $0x2b4] ss:$8 sps:$4 sm:$0xff]  }
  0x9e   :  { %1133 = vmatpush2.bf16.msra.mxu1 %v3047_v58  ;;  %1091 = vmatprep.subr.bf16.mxu0 %v3052_v59  ;;  %v3145_v58 = vld [vmem:[#allocation6 + $0x3b4] ss:$8 sps:$4 sm:$0xff]   ;;  %v3140_v59 = vld [vmem:[#allocation6 + $0x2b0] ss:$8 sps:$4 sm:$0xff]  }
  0x9f   :  { %1134 = vmatprep.subr.bf16.mxu1 %v3055_v60  ;;  %v3143_v60 = vld [vmem:[#allocation6 + $0x3b0] ss:$8 sps:$4 sm:$0xff]  }
  0xa1   :  { %1092 = vmatpush2.bf16.msra.mxu0 %v3050_v61  ;;  %v3148_v61 = vld [vmem:[#allocation6 + $0x2a4] ss:$8 sps:$4 sm:$0xff]  }
  0xa2   :  { %1135 = vmatpush2.bf16.msra.mxu1 %v3053_v62  ;;  %1093 = vmatprep.subr.bf16.mxu0 %v3058_v63  ;;  %v3151_v62 = vld [vmem:[#allocation6 + $0x3a4] ss:$8 sps:$4 sm:$0xff]   ;;  %v3146_v63 = vld [vmem:[#allocation6 + $0x2a0] ss:$8 sps:$4 sm:$0xff]  }
  0xa3   :  { %1136 = vmatprep.subr.bf16.mxu1 %v3061_v0  ;;  %v3149_v0 = vld [vmem:[#allocation6 + $0x3a0] ss:$8 sps:$4 sm:$0xff]  }
  0xa5   :  { %1094 = vmatpush2.bf16.msra.mxu0 %v3056_v1  ;;  %v3154_v1 = vld [vmem:[#allocation6 + $0x294] ss:$8 sps:$4 sm:$0xff]  }
  0xa6   :  { %1137 = vmatpush2.bf16.msra.mxu1 %v3059_v2  ;;  %1095 = vmatprep.subr.bf16.mxu0 %v3064_v3  ;;  %v3157_v2 = vld [vmem:[#allocation6 + $0x394] ss:$8 sps:$4 sm:$0xff]   ;;  %v3152_v3 = vld [vmem:[#allocation6 + $0x290] ss:$8 sps:$4 sm:$0xff]  }
  0xa7   :  { %1138 = vmatprep.subr.bf16.mxu1 %v3067_v4  ;;  %v3155_v4 = vld [vmem:[#allocation6 + $0x390] ss:$8 sps:$4 sm:$0xff]  }
  0xa9   :  { %1096 = vmatpush2.bf16.msra.mxu0 %v3062_v7  ;;  %v3160_v7 = vld [vmem:[#allocation6 + $0x284] ss:$8 sps:$4 sm:$0xff]  }
  0xaa   :  { %1139 = vmatpush2.bf16.msra.mxu1 %v3065_v8  ;;  %1497 = vmatprep.subr.bf16.mxu0 %v3070_v9  ;;  %v3163_v8 = vld [vmem:[#allocation6 + $0x384] ss:$8 sps:$4 sm:$0xff]   ;;  %v3158_v9 = vld [vmem:[#allocation6 + $0x280] ss:$8 sps:$4 sm:$0xff]  }
  0xab   :  { %1540 = vmatprep.subr.bf16.mxu1 %v3073_v10  ;;  %v3161_v10 = vld [vmem:[#allocation6 + $0x380] ss:$8 sps:$4 sm:$0xff]  }
  0xac   :  { %1098 = vmatmul.mubr.bf16.vlgmr.msra.gmra.mxu0 %v3490_v5 }
  0xad   :  { %1141 = vmatmul.mubr.bf16.vlgmr.msra.gmra.mxu1 %v3492_v6  ;;  %1498 = vmatpush1.bf16.msra.mxu0 %v3068_v11 }
  0xae   :  { %1541 = vmatpush1.bf16.msra.mxu1 %v3071_v12  ;;  %1499 = vmatprep.subr.bf16.mxu0 %v3076_v13 }
  0xaf   :  { %1542 = vmatprep.subr.bf16.mxu1 %v3079_v14  ;;  %1529 = vmatprep.mubr.bf16.mxu0 %v3484_v49  ;;  %v3103_v49 = vld [vmem:[#allocation6 + $0x324] ss:$8 sps:$4 sm:$0xff]  }
  0xb0   :  { %1572 = vmatprep.mubr.bf16.mxu1 %v3486_v51  ;;  %v3098_v51 = vld [vmem:[#allocation6 + $0x220] ss:$8 sps:$4 sm:$0xff]  }
  0xb1   :  { %1500 = vmatpush1.bf16.msra.mxu0 %v3074_v15 }
  0xb2   :  { %1543 = vmatpush1.bf16.msra.mxu1 %v3077_v16  ;;  %1501 = vmatprep.subr.bf16.mxu0 %v3082_v17 }
  0xb3   :  { %1544 = vmatprep.subr.bf16.mxu1 %v3085_v18 }
  0xb5   :  { %1502 = vmatpush1.bf16.msra.mxu0 %v3080_v19 }
  0xb6   :  { %1545 = vmatpush1.bf16.msra.mxu1 %v3083_v20  ;;  %1503 = vmatprep.subr.bf16.mxu0 %v3088_v21  ;;  %v82_v21 = vlaneseq }
  0xb7   :  { %1546 = vmatprep.subr.bf16.mxu1 %v3091_v22 }
  0xb9   :  { %1504 = vmatpush1.bf16.msra.mxu0 %v3086_v23 }
  0xba   :  { %1547 = vmatpush1.bf16.msra.mxu1 %v3089_v24  ;;  %1505 = vmatprep.subr.bf16.mxu0 %v3094_v25  ;;  %v3505_v24 = vshrl.u32 %v82_v21, 7 }
  0xbb   :  { %1548 = vmatprep.subr.bf16.mxu1 %v3097_v26 }
  0xbc   :  { %v84_v26 = vadd.s32 8, %v3505_v24  ;;  %vm1155_vm1 = vcmp.lt.s32.totalorder %v3505_v24, 1  ;;  %vm1168_vm4 = vcmp.lt.s32.totalorder %v3505_v24, 7 }
  0xbd   :  { %1506 = vmatpush1.bf16.msra.mxu0 %v3092_v27 }
  0xbe   :  { %1549 = vmatpush1.bf16.msra.mxu1 %v3095_v28  ;;  %1507 = vmatprep.subr.bf16.mxu0 %v3100_v29 }
  0xbf   :  { %1550 = vmatprep.subr.bf16.mxu1 %v3103_v49 }
  0xc1   :  { %1508 = vmatpush1.bf16.msra.mxu0 %v3098_v51 }
  0xc2   :  { %1551 = vmatpush1.bf16.msra.mxu1 %v3101_v30  ;;  %1509 = vmatprep.subr.bf16.mxu0 %v3106_v31  ;;  %v96_v30 = vand.u32 7, %v84_v26 }
  0xc3   :  { %1552 = vmatprep.subr.bf16.mxu1 %v3109_v32 }
  0xc4   :  { %vm110_vm3 = vcmp.gt.s32.totalorder %v96_v30, 0  ;;  %vm116_vm5 = vcmp.lt.s32.totalorder %v96_v30, 7 }
  0xc5   :  { %1510 = vmatpush1.bf16.msra.mxu0 %v3104_v33 }
  0xc6   :  { %1553 = vmatpush1.bf16.msra.mxu1 %v3107_v34  ;;  %1511 = vmatprep.subr.bf16.mxu0 %v3112_v35 }
  0xc7   :  { %1554 = vmatprep.subr.bf16.mxu1 %v3115_v36 }
  0xc9   :  { %1512 = vmatpush1.bf16.msra.mxu0 %v3110_v37 }
  0xca   :  { %1555 = vmatpush1.bf16.msra.mxu1 %v3113_v38  ;;  %1513 = vmatprep.subr.bf16.mxu0 %v3118_v39  ;;  %v3409_v38 = vmov 0.0  }
  0xcb   :  { %1556 = vmatprep.subr.bf16.mxu1 %v3121_v40 }
  0xcd   :  { %1514 = vmatpush2.bf16.msra.mxu0 %v3116_v41 }
  0xce   :  { %1557 = vmatpush2.bf16.msra.mxu1 %v3119_v42  ;;  %1515 = vmatprep.subr.bf16.mxu0 %v3124_v43 }
  0xcf   :  { %1558 = vmatprep.subr.bf16.mxu1 %v3127_v44 }
  0xd1   :  { %1516 = vmatpush2.bf16.msra.mxu0 %v3122_v45 }
  0xd2   :  { %1559 = vmatpush2.bf16.msra.mxu1 %v3125_v46  ;;  %1517 = vmatprep.subr.bf16.mxu0 %v3130_v47  ;;  %v3518_v47 = vsub.s32 0, %v3505_v24 }
  0xd3   :  { %1560 = vmatprep.subr.bf16.mxu1 %v3133_v48 }
  0xd5   :  { %1518 = vmatpush2.bf16.msra.mxu0 %v3128_v50 }
  0xd6   :  { %1561 = vmatpush2.bf16.msra.mxu1 %v3131_v52  ;;  %1519 = vmatprep.subr.bf16.mxu0 %v3136_v53  ;;  %v3523_v52 = vsel %vm110_vm3, 1.0, %v3409_v38  ;;  %v1587_v53 = vld [vmem:[%s3656_s2] sm:$0x3] }
  0xd7   :  { %1562 = vmatprep.subr.bf16.mxu1 %v3139_v54 }
  0xd9   :  { %1520 = vmatpush2.bf16.msra.mxu0 %v3134_v55 }
  0xda   :  { %1563 = vmatpush2.bf16.msra.mxu1 %v3137_v56  ;;  %1521 = vmatprep.subr.bf16.mxu0 %v3142_v57 }
  0xdb   :  { %1564 = vmatprep.subr.bf16.mxu1 %v3145_v58 }
  0xdd   :  { %1522 = vmatpush2.bf16.msra.mxu0 %v3140_v59  ;;  %v3533_v59 = vsub.s32 1, %v3505_v24 }
  0xde   :  { %1565 = vmatpush2.bf16.msra.mxu1 %v3143_v60  ;;  %1523 = vmatprep.subr.bf16.mxu0 %v3148_v61 }
  0xdf   :  { %1566 = vmatprep.subr.bf16.mxu1 %v3151_v62 }
  0xe1   :  { %1524 = vmatpush2.bf16.msra.mxu0 %v3146_v63 }
  0xe2   :  { %1567 = vmatpush2.bf16.msra.mxu1 %v3149_v0  ;;  %1525 = vmatprep.subr.bf16.mxu0 %v3154_v1 }
  0xe3   :  { %1568 = vmatprep.subr.bf16.mxu1 %v3157_v2  ;;  %v3540_v2 = vsel %vm116_vm5, 1.0, %v3409_v38 }
  0xe5   :  { %1526 = vmatpush2.bf16.msra.mxu0 %v3152_v3  ;;  %v1592_v3 = vrot.slane %v1587_v53, %v3518_v47 }
  0xe6   :  { %1569 = vmatpush2.bf16.msra.mxu1 %v3155_v4  ;;  %1527 = vmatprep.subr.bf16.mxu0 %v3160_v7 }
  0xe7   :  { %1570 = vmatprep.subr.bf16.mxu1 %v3163_v8 }
  0xe9   :  { %1528 = vmatpush2.bf16.msra.mxu0 %v3158_v9 }
  0xea   :  { %1571 = vmatpush2.bf16.msra.mxu1 %v3161_v10 }
  0xec   :  { %1530 = vmatmul.mubr.bf16.vlgmr.msra.gmra.mxu0 %v3490_v5 }
  0xed   :  { %1573 = vmatmul.mubr.bf16.vlgmr.msra.gmra.mxu1 %v3492_v6  ;;  %v89_v6 = vand.u32 7, %v3505_v24 }
  0xef   :  { %vm109_vm0 = vcmp.gt.s32.totalorder %v89_v6, 0  ;;  %vm115_vm2 = vcmp.lt.s32.totalorder %v89_v6, 7 }
  0xf0   :  { %v3510_v39 = vsel %vm109_vm0, 1.0, %v3409_v38  ;;  %v3521_v50 = vsel %vm115_vm2, 1.0, %v3409_v38  ;;  %v3172_v38 = vld [vmem:[#allocation8 + $0x64] ss:$8 sps:$4 sm:$0xff]  }
 0x12c   :  { %v563_v11 = vpop.f32.mrf.mxu0 }
 0x12d   :  { %v606_v12 = vpop.f32.mrf.mxu1 }
 0x12e   :  { %v565_v13 = vpop.f32.mrf.mxu0  ;;  %v607_v28 = vadd.f32 %v606_v12, %v563_v11 }
 0x12f   :  { %v608_v14 = vpop.f32.mrf.mxu1 }
 0x130   :  { %v567_v15 = vpop.f32.mrf.mxu0  ;;  %v609_v31 = vadd.f32 %v608_v14, %v565_v13  ;;  %v1151_v34 = vrot.slane %v607_v28, 7 }
 0x131   :  { %v610_v16 = vpop.f32.mrf.mxu1 }
 0x132   :  { %v569_v17 = vpop.f32.mrf.mxu0  ;;  %v611_v27 = vadd.f32 %v610_v16, %v567_v15  ;;  %v1152_v40 = vrot.slane %v609_v31, 7  ;;  %v1596_v15 = vrot.slane %v1587_v53, %v3533_v59  ;;  %v3187_v53 = vld [vmem:[#allocation8 + $0x244] ss:$8 sps:$4 sm:$0xff]  }
 0x133   :  { %v612_v18 = vpop.f32.mrf.mxu1 }
 0x134   :  { %v613_v29 = vadd.f32 %v612_v18, %v569_v17  ;;  %v1153_v32 = vrot.slane %v611_v27, 7 }
 0x136   :  { %v1154_v35 = vrot.slane %v613_v29, 7  ;;  %v1158_v43 = vsel %vm1155_vm1, %v1153_v32, %v1151_v34  ;;  %v1156_v58 = vsel %vm1155_vm1, %v1151_v34, %v1153_v32  ;;  %v3164_v34 = vld [vmem:[#allocation8 + $0x70] ss:$8 sps:$4 sm:$0xff]  }
 0x137   :  { %v1160_v48 = vmul.f32 %v3510_v39, %v1158_v43  ;;  %v1162_v9 = vmul.f32 %v3523_v52, %v1156_v58  ;;  %v3178_v43 = vld [vmem:[#allocation8 + $0x54] ss:$8 sps:$4 sm:$0xff]   ;;  %v3188_v58 = vld [vmem:[#allocation8 + $0x30] ss:$8 sps:$4 sm:$0xff]  }
 0x138   :  { %v1159_v46 = vsel %vm1155_vm1, %v1154_v35, %v1152_v40  ;;  %v1157_v62 = vsel %vm1155_vm1, %v1152_v40, %v1154_v35  ;;  %v3166_v35 = vld [vmem:[#allocation8 + $0x74] ss:$8 sps:$4 sm:$0xff]   ;;  %v3175_v40 = vld [vmem:[#allocation8 + $0x264] ss:$8 sps:$4 sm:$0xff]  }
 0x139   :  { %v1161_v61 = vmul.f32 %v3510_v39, %v1159_v46  ;;  %v1163_v13 = vmul.f32 %v3523_v52, %v1157_v62  ;;  %1866 = vmatprep.subr.bf16.mxu0 %v3166_v35  ;;  %v3179_v46 = vld [vmem:[#allocation8 + $0x250] ss:$8 sps:$4 sm:$0xff]   ;;  %v3199_v62 = vld [vmem:[#allocation8 + $0x224] ss:$8 sps:$4 sm:$0xff]  }
 0x13a   :  { %1867 = vmatpush1.bf16.msra.mxu0 %v3164_v34  ;;  %v3229_v34 = vld [vmem:[#allocation8 + $0x2d4] ss:$8 sps:$4 sm:$0xff]   ;;  %v3227_v35 = vld [vmem:[#allocation8 + $0x2d0] ss:$8 sps:$4 sm:$0xff]  }
 0x13b   :  { %1868 = vmatprep.subr.bf16.mxu0 %v3172_v38  ;;  %v3235_v38 = vld [vmem:[#allocation8 + $0x2c4] ss:$8 sps:$4 sm:$0xff]  }
 0x16c   :  { %v1099_v19 = vpop.f32.mrf.mxu0 }
 0x16d   :  { %v1142_v20 = vpop.f32.mrf.mxu1 }
 0x16e   :  { %v1101_v22 = vpop.f32.mrf.mxu0  ;;  %v1143_v36 = vadd.f32 %v1142_v20, %v1099_v19 }
 0x16f   :  { %v1144_v23 = vpop.f32.mrf.mxu1 }
 0x170   :  { %v1103_v25 = vpop.f32.mrf.mxu0  ;;  %v1145_v41 = vadd.f32 %v1144_v23, %v1101_v22  ;;  %v1164_v44 = vrot.slane %v1143_v36, 1  ;;  %v3167_v36 = vld [vmem:[#allocation8 + $0x270] ss:$8 sps:$4 sm:$0xff]  }
 0x171   :  { %v1146_v5 = vpop.f32.mrf.mxu1 }
 0x172   :  { %v1105_v49 = vpop.f32.mrf.mxu0  ;;  %v1147_v33 = vadd.f32 %v1146_v5, %v1103_v25  ;;  %v1165_v54 = vrot.slane %v1145_v41, 1  ;;  %v3170_v41 = vld [vmem:[#allocation8 + $0x60] ss:$8 sps:$4 sm:$0xff]  }
 0x173   :  { %v1148_v51 = vpop.f32.mrf.mxu1  ;;  %1869 = vmatpush1.bf16.msra.mxu0 %v3170_v41  ;;  %v3238_v41 = vld [vmem:[#allocation8 + $0xb4] ss:$8 sps:$4 sm:$0xff]  }
 0x174   :  { %v1149_v37 = vadd.f32 %v1148_v51, %v1105_v49  ;;  %v1166_v42 = vrot.slane %v1147_v33, 1  ;;  %1870 = vmatprep.subr.bf16.mxu0 %v3178_v43  ;;  %v3236_v43 = vld [vmem:[#allocation8 + $0xb0] ss:$8 sps:$4 sm:$0xff]  }
 0x176   :  { %v1167_v45 = vrot.slane %v1149_v37, 1  ;;  %v1169_v56 = vsel %vm1168_vm4, %v1164_v44, %v1166_v42  ;;  %v1171_v11 = vsel %vm1168_vm4, %v1166_v42, %v1164_v44  ;;  %v3169_v37 = vld [vmem:[#allocation8 + $0x274] ss:$8 sps:$4 sm:$0xff]   ;;  %v3173_v42 = vld [vmem:[#allocation8 + $0x260] ss:$8 sps:$4 sm:$0xff]  }
 0x177   :  { %v1173_v4 = vmul.f32 %v3521_v50, %v1169_v56  ;;  %v1175_v23 = vmul.f32 %v3540_v2, %v1171_v11  ;;  %2135 = vmatprep.subr.bf16.mxu1 %v3169_v37  ;;  %v3181_v44 = vld [vmem:[#allocation8 + $0x254] ss:$8 sps:$4 sm:$0xff]   ;;  %v3209_v11 = vld [vmem:[#allocation8 + $0x200] ss:$8 sps:$4 sm:$0xff]  }
 0x178   :  { %v1170_v0 = vsel %vm1168_vm4, %v1165_v54, %v1167_v45  ;;  %v1172_v14 = vsel %vm1168_vm4, %v1167_v45, %v1165_v54  ;;  %2136 = vmatpush1.bf16.msra.mxu1 %v3167_v36  ;;  %v3176_v45 = vld [vmem:[#allocation8 + $0x50] ss:$8 sps:$4 sm:$0xff]   ;;  %v3182_v54 = vld [vmem:[#allocation8 + $0x40] ss:$8 sps:$4 sm:$0xff]   ;;  %v3190_v56 = vld [vmem:[#allocation8 + $0x34] ss:$8 sps:$4 sm:$0xff]  }
 0x179   :  { %v1174_v17 = vmul.f32 %v3521_v50, %v1170_v0  ;;  %v1176_v6 = vmul.f32 %v3540_v2, %v1172_v14  ;;  %2137 = vmatprep.subr.bf16.mxu1 %v3175_v40  ;;  %1871 = vmatpush1.bf16.msra.mxu0 %v3176_v45  ;;  %v3197_v0 = vld [vmem:[#allocation8 + $0x220] ss:$8 sps:$4 sm:$0xff]   ;;  %v3232_v36 = vld [vmem:[#allocation8 + $0xc4] ss:$8 sps:$4 sm:$0xff]  }
 0x17a   :  { %v3230_v37 = vld [vmem:[#allocation8 + $0xc0] ss:$8 sps:$4 sm:$0xff]   ;;  %v3244_v45 = vld [vmem:[#allocation8 + $0xa4] ss:$8 sps:$4 sm:$0xff]  }
 0x17b   :  { %v3233_v40 = vld [vmem:[#allocation8 + $0x2c0] ss:$8 sps:$4 sm:$0xff]  }
 0x17c   :  { %2138 = vmatpush1.bf16.msra.mxu1 %v3173_v42  ;;  %v3241_v42 = vld [vmem:[#allocation8 + $0x2b4] ss:$8 sps:$4 sm:$0xff]  }
 0x17d   :  { %2139 = vmatprep.subr.bf16.mxu1 %v3181_v44  ;;  %v3239_v44 = vld [vmem:[#allocation8 + $0x2b0] ss:$8 sps:$4 sm:$0xff]  }
 0x180   :  { %2140 = vmatpush1.bf16.msra.mxu1 %v3179_v46  ;;  %v3247_v46 = vld [vmem:[#allocation8 + $0x2a4] ss:$8 sps:$4 sm:$0xff]  }
 0x181   :  { %2141 = vmatprep.subr.bf16.mxu1 %v3187_v53  ;;  %v3245_v53 = vld [vmem:[#allocation8 + $0x2a0] ss:$8 sps:$4 sm:$0xff]  }
 0x1ac   :  { %v1531_v55 = vpop.f32.mrf.mxu0 }
 0x1ad   :  { %v1574_v57 = vpop.f32.mrf.mxu1  ;;  %v1532_v60 = vadd.f32 %v1531_v55, %v1160_v48  ;;  %v3184_v48 = vld [vmem:[#allocation8 + $0x44] ss:$8 sps:$4 sm:$0xff]   ;;  %v3185_v55 = vld [vmem:[#allocation8 + $0x240] ss:$8 sps:$4 sm:$0xff]  }
 0x1ae   :  { %v1533_v63 = vpop.f32.mrf.mxu0  ;;  %1872 = vmatprep.subr.bf16.mxu0 %v3184_v48  ;;  %2142 = vmatpush1.bf16.msra.mxu1 %v3185_v55  ;;  %v3242_v48 = vld [vmem:[#allocation8 + $0xa0] ss:$8 sps:$4 sm:$0xff]   ;;  %v3253_v55 = vld [vmem:[#allocation8 + $0x294] ss:$8 sps:$4 sm:$0xff]  }
 0x1af   :  { %v1576_v1 = vpop.f32.mrf.mxu1  ;;  %v1575_v7 = vadd.f32 %v1574_v57, %v1532_v60  ;;  %v1534_v8 = vadd.f32 %v1533_v63, %v1161_v61  ;;  %v3193_v57 = vld [vmem:[#allocation8 + $0x234] ss:$8 sps:$4 sm:$0xff]   ;;  %1873 = vmatpush1.bf16.msra.mxu0 %v3182_v54  ;;  %v3191_v60 = vld [vmem:[#allocation8 + $0x230] ss:$8 sps:$4 sm:$0xff]   ;;  %v3196_v61 = vld [vmem:[#allocation8 + $0x24] ss:$8 sps:$4 sm:$0xff]  }
 0x1b0   :  { %v1535_v10 = vpop.f32.mrf.mxu0  ;;  %1874 = vmatprep.subr.bf16.mxu0 %v3190_v56  ;;  %2143 = vmatprep.subr.bf16.mxu1 %v3193_v57  ;;  %v3194_v63 = vld [vmem:[#allocation8 + $0x20] ss:$8 sps:$4 sm:$0xff]   ;;  %v3250_v54 = vld [vmem:[#allocation8 + $0x94] ss:$8 sps:$4 sm:$0xff]   ;;  %v3248_v56 = vld [vmem:[#allocation8 + $0x90] ss:$8 sps:$4 sm:$0xff]  }
 0x1b1   :  { %v1578_v12 = vpop.f32.mrf.mxu1  ;;  %v1583_v16 = vadd.f32 %v1575_v7, %v1173_v4  ;;  %v1577_v18 = vadd.f32 %v1576_v1, %v1534_v8  ;;  %v1536_v19 = vadd.f32 %v1535_v10, %v1162_v9  ;;  %v3202_v1 = vld [vmem:[#allocation8 + $0x14] ss:$8 sps:$4 sm:$0xff]   ;;  %v3200_v4 = vld [vmem:[#allocation8 + $0x10] ss:$8 sps:$4 sm:$0xff]   ;;  %v3208_v8 = vld [vmem:[#allocation8 + $0x4] ss:$8 sps:$4 sm:$0xff]  }
 0x1b2   :  { %v1537_v20 = vpop.f32.mrf.mxu0  ;;  %2144 = vmatpush1.bf16.msra.mxu1 %v3191_v60  ;;  %v3203_v7 = vld [vmem:[#allocation8 + $0x210] ss:$8 sps:$4 sm:$0xff]   ;;  %v3211_v9 = vld [vmem:[#allocation8 + $0x204] ss:$8 sps:$4 sm:$0xff]   ;;  %v3206_v10 = vld [vmem:[#allocation8] ss:$8 sps:$4 sm:$0xff]  }
 0x1b3   :  { %v1584_v22 = vadd.f32 %v1577_v18, %v1174_v17  ;;  %v1579_v25 = vadd.f32 %v1578_v12, %v1536_v19  ;;  %v1538_v5 = vadd.f32 %v1537_v20, %v1163_v13  ;;  %v1580_v26 = vpop.f32.mrf.mxu1  ;;  %v3554_v29 = vadd.f32 %v1592_v3, %v1583_v16  ;;  %1875 = vmatpush1.bf16.msra.mxu0 %v3188_v58  ;;  %v3251_v57 = vld [vmem:[#allocation8 + $0x290] ss:$8 sps:$4 sm:$0xff]   ;;  %v3256_v58 = vld [vmem:[#allocation8 + $0x84] ss:$8 sps:$4 sm:$0xff]  }
 0x1b4   :  { %1876 = vmatprep.subr.bf16.mxu0 %v3196_v61  ;;  %2145 = vmatprep.subr.bf16.mxu1 %v3199_v62  ;;  %v3259_v60 = vld [vmem:[#allocation8 + $0x284] ss:$8 sps:$4 sm:$0xff]   ;;  %v3254_v61 = vld [vmem:[#allocation8 + $0x80] ss:$8 sps:$4 sm:$0xff]  }
 0x1b5   :  { %v1585_v27 = vadd.f32 %v1579_v25, %v1175_v23  ;;  %v1581_v28 = vadd.f32 %v1580_v26, %v1538_v5  ;;  %v3556_v49 = vadd.f32 %v1596_v15, %v1584_v22  ;;  %v3214_v26 = vld [vmem:[#allocation8 + $0xf4] ss:$8 sps:$4 sm:$0xff]   ;;  %v3257_v62 = vld [vmem:[#allocation8 + $0x280] ss:$8 sps:$4 sm:$0xff]  }
 0x1b6   :  { %2146 = vmatpush1.bf16.msra.mxu1 %v3197_v0 }
 0x1b7   :  { %v1586_v51 = vadd.f32 %v1581_v28, %v1176_v6  ;;  %v1603_v30 = vadd.f32 %v3556_v49, %v3554_v29  ;;  %v3560_v31 = vadd.f32 %v1592_v3, %v1585_v27  ;;  %v3205_v3 = vld [vmem:[#allocation8 + $0x214] ss:$8 sps:$4 sm:$0xff]   ;;  %1877 = vmatpush1.bf16.msra.mxu0 %v3194_v63  ;;  %v3212_v27 = vld [vmem:[#allocation8 + $0xf0] ss:$8 sps:$4 sm:$0xff]  }
 0x1b8   :  { %1878 = vmatprep.subr.bf16.mxu0 %v3202_v1  ;;  %2147 = vmatprep.subr.bf16.mxu1 %v3205_v3  ;;  %v3217_v28 = vld [vmem:[#allocation8 + $0x2f4] ss:$8 sps:$4 sm:$0xff]  }
 0x1b9   :  { %1604 = vadd.xlane.f32.xlu0 %v1603_v30  ;;  %v3562_v32 = vadd.f32 %v1596_v15, %v1586_v51  ;;  %v3218_v51 = vld [vmem:[#allocation8 + $0xe0] ss:$8 sps:$4 sm:$0xff]   ;;  %v3223_v30 = vld [vmem:[#allocation8 + $0x2e4] ss:$8 sps:$4 sm:$0xff]   ;;  %v3262_v63 = vld [vmem:[#allocation8 + $0x174] ss:$8 sps:$4 sm:$0xff]  }
 0x1ba   :  { %2148 = vmatpush1.bf16.msra.mxu1 %v3203_v7 }
 0x1bb   :  { %v1606_v33 = vadd.f32 %v3562_v32, %v3560_v31  ;;  %1879 = vmatpush1.bf16.msra.mxu0 %v3200_v4  ;;  %2149 = vmatprep.subr.bf16.mxu1 %v3211_v9  ;;  %v1636_v9 = vld [vmem:[%s3657_s3] sm:$0x3] }
 0x1bc   :  { %1880 = vmatprep.subr.bf16.mxu0 %v3208_v8 }
 0x1bd   :  { %1607 = vadd.xlane.f32.xlu0 %v1606_v33  ;;  %v3224_v33 = vld [vmem:[#allocation8 + $0xd0] ss:$8 sps:$4 sm:$0xff]  }
 0x1be   :  { %2150 = vmatpush1.bf16.msra.mxu1 %v3209_v11  ;;  %v1645_v11 = vrot.slane %v1636_v9, %v3533_v59 }
 0x1bf   :  { %1881 = vmatpush1.bf16.msra.mxu0 %v3206_v10  ;;  %2151 = vmatprep.subr.bf16.mxu1 %v3217_v28  ;;  %v1641_v10 = vrot.slane %v1636_v9, %v3518_v47  ;;  %v3305_v9 = vld [vmem:[#allocation8 + $0x180] ss:$8 sps:$4 sm:$0xff]  }
 0x1c0   :  { %1882 = vmatprep.subr.bf16.mxu0 %v3214_v26 }
 0x1c3   :  { %1883 = vmatpush2.bf16.msra.mxu0 %v3212_v27 }
 0x242   :  { %v1605_v12 = vpop.xlane.xlu0 %1604 }
 0x243   :  { %v1610_v13 = vmul.f32 0.00390625, %v1605_v12 }
 0x245   :  { %v3567_v14 = vsub.f32 %v3554_v29, %v1610_v13  ;;  %v3570_v15 = vsub.f32 %v3556_v49, %v1610_v13  ;;  %v3215_v29 = vld [vmem:[#allocation8 + $0x2f0] ss:$8 sps:$4 sm:$0xff]   ;;  %v3220_v49 = vld [vmem:[#allocation8 + $0xe4] ss:$8 sps:$4 sm:$0xff]   ;;  %v1652_v13 = vld [vmem:[%s3658_s4] sm:$0x3] }
 0x246   :  { %v1608_v16 = vpop.xlane.xlu0 %1607  ;;  %2152 = vmatpush2.bf16.msra.mxu1 %v3215_v29  ;;  %1884 = vmatprep.subr.bf16.mxu0 %v3220_v49 }
 0x247   :  { %v1611_v17 = vmul.f32 0.00390625, %v1608_v16  ;;  %v1616_v18 = vmul.f32 %v3567_v14, %v3567_v14  ;;  %v1617_v19 = vmul.f32 %v3570_v15, %v3570_v15  ;;  %1885 = vmatpush2.bf16.msra.mxu0 %v3218_v51  ;;  %2153 = vmatprep.subr.bf16.mxu1 %v3223_v30 }
 0x249   :  { %v3577_v20 = vsub.f32 %v3560_v31, %v1611_v17  ;;  %v3580_v22 = vsub.f32 %v3562_v32, %v1611_v17  ;;  %v1620_v23 = vadd.f32 %v1617_v19, %v1616_v18  ;;  %v3221_v31 = vld [vmem:[#allocation8 + $0x2e0] ss:$8 sps:$4 sm:$0xff]   ;;  %v3226_v32 = vld [vmem:[#allocation8 + $0xd4] ss:$8 sps:$4 sm:$0xff]   ;;  %v1657_v19 = vrot.slane %v1652_v13, %v3518_v47 }
 0x24a   :  { %2154 = vmatpush2.bf16.msra.mxu1 %v3221_v31  ;;  %1886 = vmatprep.subr.bf16.mxu0 %v3226_v32 }
 0x24b   :  { %1621 = vadd.xlane.f32.xlu1 %v1620_v23  ;;  %v1618_v25 = vmul.f32 %v3577_v20, %v3577_v20  ;;  %v1619_v5 = vmul.f32 %v3580_v22, %v3580_v22  ;;  %1887 = vmatpush2.bf16.msra.mxu0 %v3224_v33  ;;  %v1661_v23 = vrot.slane %v1652_v13, %v3533_v59 }
 0x24c   :  { %2155 = vmatprep.subr.bf16.mxu1 %v3229_v34  ;;  %1888 = vmatprep.subr.bf16.mxu0 %v3232_v36  ;;  %v3260_v34 = vld [vmem:[#allocation8 + $0x170] ss:$8 sps:$4 sm:$0xff]   ;;  %v3265_v36 = vld [vmem:[#allocation8 + $0x164] ss:$8 sps:$4 sm:$0xff]  }
 0x24d   :  { %v1623_v6 = vadd.f32 %v1619_v5, %v1618_v25 }
 0x24e   :  { %2156 = vmatpush2.bf16.msra.mxu1 %v3227_v35 }
 0x24f   :  { %1624 = vadd.xlane.f32.xlu1 %v1623_v6  ;;  %2157 = vmatprep.subr.bf16.mxu1 %v3235_v38  ;;  %v3271_v38 = vld [vmem:[#allocation8 + $0x144] ss:$8 sps:$4 sm:$0xff]  }
 0x250   :  { %1889 = vmatpush2.bf16.msra.mxu0 %v3230_v37  ;;  %v3266_v37 = vld [vmem:[#allocation8 + $0x150] ss:$8 sps:$4 sm:$0xff]  }
 0x251   :  { %1890 = vmatprep.subr.bf16.mxu0 %v3238_v41  ;;  %v3274_v41 = vld [vmem:[#allocation8 + $0x134] ss:$8 sps:$4 sm:$0xff]  }
 0x252   :  { %2158 = vmatpush2.bf16.msra.mxu1 %v3233_v40  ;;  %v3269_v40 = vld [vmem:[#allocation8 + $0x140] ss:$8 sps:$4 sm:$0xff]  }
 0x253   :  { %2159 = vmatprep.subr.bf16.mxu1 %v3241_v42  ;;  %v3272_v42 = vld [vmem:[#allocation8 + $0x130] ss:$8 sps:$4 sm:$0xff]  }
 0x254   :  { %1891 = vmatpush2.bf16.msra.mxu0 %v3236_v43  ;;  %v3277_v43 = vld [vmem:[#allocation8 + $0x124] ss:$8 sps:$4 sm:$0xff]  }
 0x255   :  { %1892 = vmatprep.subr.bf16.mxu0 %v3244_v45  ;;  %v3280_v45 = vld [vmem:[#allocation8 + $0x114] ss:$8 sps:$4 sm:$0xff]  }
 0x256   :  { %2160 = vmatpush2.bf16.msra.mxu1 %v3239_v44  ;;  %v3275_v44 = vld [vmem:[#allocation8 + $0x120] ss:$8 sps:$4 sm:$0xff]  }
 0x257   :  { %2161 = vmatprep.subr.bf16.mxu1 %v3247_v46  ;;  %v3278_v46 = vld [vmem:[#allocation8 + $0x110] ss:$8 sps:$4 sm:$0xff]  }
 0x258   :  { %1893 = vmatpush2.bf16.msra.mxu0 %v3242_v48  ;;  %v3283_v48 = vld [vmem:[#allocation8 + $0x104] ss:$8 sps:$4 sm:$0xff]  }
 0x259   :  { %1894 = vmatprep.subr.bf16.mxu0 %v3250_v54  ;;  %v3286_v54 = vld [vmem:[#allocation8 + $0x1f4] ss:$8 sps:$4 sm:$0xff]  }
 0x25a   :  { %2162 = vmatpush2.bf16.msra.mxu1 %v3245_v53  ;;  %v3281_v53 = vld [vmem:[#allocation8 + $0x100] ss:$8 sps:$4 sm:$0xff]  }
 0x25b   :  { %2163 = vmatprep.subr.bf16.mxu1 %v3253_v55  ;;  %v3284_v55 = vld [vmem:[#allocation8 + $0x1f0] ss:$8 sps:$4 sm:$0xff]  }
 0x25c   :  { %1895 = vmatpush2.bf16.msra.mxu0 %v3248_v56  ;;  %v3289_v56 = vld [vmem:[#allocation8 + $0x1e4] ss:$8 sps:$4 sm:$0xff]  }
 0x25d   :  { %1896 = vmatprep.subr.bf16.mxu0 %v3256_v58  ;;  %v3292_v58 = vld [vmem:[#allocation8 + $0x1d4] ss:$8 sps:$4 sm:$0xff]  }
 0x25e   :  { %2164 = vmatpush2.bf16.msra.mxu1 %v3251_v57  ;;  %v3287_v57 = vld [vmem:[#allocation8 + $0x1e0] ss:$8 sps:$4 sm:$0xff]  }
 0x25f   :  { %2165 = vmatprep.subr.bf16.mxu1 %v3259_v60  ;;  %v3290_v60 = vld [vmem:[#allocation8 + $0x1d0] ss:$8 sps:$4 sm:$0xff]  }
 0x260   :  { %1897 = vmatpush2.bf16.msra.mxu0 %v3254_v61  ;;  %v3295_v61 = vld [vmem:[#allocation8 + $0x1c4] ss:$8 sps:$4 sm:$0xff]  }
 0x261   :  { %2362 = vmatprep.subr.bf16.mxu0 %v3262_v63  ;;  %v3298_v63 = vld [vmem:[#allocation8 + $0x1b4] ss:$8 sps:$4 sm:$0xff]  }
 0x262   :  { %2166 = vmatpush2.bf16.msra.mxu1 %v3257_v62  ;;  %v3293_v62 = vld [vmem:[#allocation8 + $0x1c0] ss:$8 sps:$4 sm:$0xff]  }
 0x2d4   :  { %v1622_v0 = vpop.xlane.xlu1 %1621 }
 0x2d5   :  { %v1626_v1 = vmul.f32 0.00390625, %v1622_v0  ;;  %v3296_v0 = vld [vmem:[#allocation8 + $0x1b0] ss:$8 sps:$4 sm:$0xff]  }
 0x2d7   :  { %v1628_v3 = vadd.f32 1e-05, %v1626_v1  ;;  %v3301_v1 = vld [vmem:[#allocation8 + $0x1a4] ss:$8 sps:$4 sm:$0xff]  }
 0x2d8   :  { %v1625_v4 = vpop.xlane.xlu1 %1624 }
 0x2d9   :  { %3308 = vrsqrt.f32 %v1628_v3  ;;  %v1627_v7 = vmul.f32 0.00390625, %v1625_v4  ;;  %v3299_v3 = vld [vmem:[#allocation8 + $0x1a0] ss:$8 sps:$4 sm:$0xff]   ;;  %v3304_v4 = vld [vmem:[#allocation8 + $0x194] ss:$8 sps:$4 sm:$0xff]  }
 0x2db   :  { %v1629_v8 = vadd.f32 1e-05, %v1627_v7  ;;  %v3302_v7 = vld [vmem:[#allocation8 + $0x190] ss:$8 sps:$4 sm:$0xff]  }
 0x2dd   :  { %3310 = vrsqrt.f32 %v1629_v8  ;;  %v3307_v8 = vld [vmem:[#allocation8 + $0x184] ss:$8 sps:$4 sm:$0xff]  }
 0x2e6   :  { %v3309_v12 = vpop.eup %3308 }
 0x2e7   :  { %v1633_v16 = vmul.f32 %v3309_v12, %v3570_v15  ;;  %v1632_v17 = vmul.f32 %v3309_v12, %v3567_v14 }
 0x2e9   :  { %v1649_v18 = vmul.f32 %v1645_v11, %v1633_v16  ;;  %v1648_v25 = vmul.f32 %v1641_v10, %v1632_v17 }
 0x2ea   :  { %v3311_v5 = vpop.eup %3310 }
 0x2eb   :  { %v1635_v6 = vmul.f32 %v3311_v5, %v3580_v22  ;;  %v1634_v26 = vmul.f32 %v3311_v5, %v3577_v20  ;;  %v1665_v28 = vadd.f32 %v1661_v23, %v1649_v18  ;;  %v1664_v49 = vadd.f32 %v1657_v19, %v1648_v25  ;;  %v3263_v20 = vld [vmem:[#allocation8 + $0x160] ss:$8 sps:$4 sm:$0xff]   ;;  %v3268_v22 = vld [vmem:[#allocation8 + $0x154] ss:$8 sps:$4 sm:$0xff]  }
 0x2ed   :  { %v1651_v27 = vmul.f32 %v1645_v11, %v1635_v6  ;;  %v1650_v29 = vmul.f32 %v1641_v10, %v1634_v26  ;;  %v1669_v15 = vmax.f32 %v1665_v28, 0.0  ;;  %v1668_v14 = vmax.f32 %v1664_v49, 0.0 }
 0x2ef   :  { %v1667_v51 = vadd.f32 %v1661_v23, %v1651_v27  ;;  %v1666_v30 = vadd.f32 %v1657_v19, %v1650_v29 }
 0x2f1   :  { %v1671_v31 = vmax.f32 %v1667_v51, 0.0  ;;  %v1670_v32 = vmax.f32 %v1666_v30, 0.0 }
 0x2f3   :  { %v1673_v33 = vpack.c.bf16 %v1671_v31, %v1669_v15  ;;  %v3600_v35 = vpack.c.bf16 %v1670_v32, %v1668_v14  ;;  %v2409_v15 = vld [vmem:[%s3660_s6] sm:$0x3] }
 0x2f5   :  { %1898 = vmatprep.mubr.bf16.mxu0 %v1673_v33  ;;  %2167 = vmatprep.mubr.bf16.mxu1 %v1673_v33 }
 0x2f6   :  { %1899 = vmatmul.mubr.bf16.vlgmr.msra.gmra.mxu0 %v3600_v35  ;;  %2168 = vmatmul.mubr.bf16.vlgmr.msra.gmra.mxu1 %v3600_v35 }
 0x2f7   :  { %2363 = vmatpush1.bf16.msra.mxu0 %v3260_v34  ;;  %2394 = vmatprep.mubr.bf16.mxu0 %v1673_v33 }
 0x2f8   :  { %2364 = vmatprep.subr.bf16.mxu0 %v3265_v36 }
 0x2fb   :  { %2365 = vmatpush1.bf16.msra.mxu0 %v3263_v20  ;;  %v2414_v20 = vrot.slane %v2409_v15, %v3518_v47 }
 0x2fc   :  { %2366 = vmatprep.subr.bf16.mxu0 %v3268_v22 }
 0x2ff   :  { %2367 = vmatpush1.bf16.msra.mxu0 %v3266_v37 }
 0x300   :  { %2368 = vmatprep.subr.bf16.mxu0 %v3271_v38 }
 0x303   :  { %2369 = vmatpush1.bf16.msra.mxu0 %v3269_v40 }
 0x304   :  { %2370 = vmatprep.subr.bf16.mxu0 %v3274_v41  ;;  %v2418_v41 = vrot.slane %v2409_v15, %v3533_v59 }
 0x307   :  { %2371 = vmatpush1.bf16.msra.mxu0 %v3272_v42 }
 0x308   :  { %2372 = vmatprep.subr.bf16.mxu0 %v3277_v43 }
 0x30b   :  { %2373 = vmatpush1.bf16.msra.mxu0 %v3275_v44 }
 0x30c   :  { %2374 = vmatprep.subr.bf16.mxu0 %v3280_v45 }
 0x30f   :  { %2375 = vmatpush1.bf16.msra.mxu0 %v3278_v46 }
 0x310   :  { %2376 = vmatprep.subr.bf16.mxu0 %v3283_v48 }
 0x313   :  { %2377 = vmatpush1.bf16.msra.mxu0 %v3281_v53 }
 0x314   :  { %2378 = vmatprep.subr.bf16.mxu0 %v3286_v54 }
 0x317   :  { %2379 = vmatpush2.bf16.msra.mxu0 %v3284_v55 }
 0x318   :  { %2380 = vmatprep.subr.bf16.mxu0 %v3289_v56 }
 0x31b   :  { %2381 = vmatpush2.bf16.msra.mxu0 %v3287_v57 }
 0x31c   :  { %2382 = vmatprep.subr.bf16.mxu0 %v3292_v58 }
 0x31f   :  { %2383 = vmatpush2.bf16.msra.mxu0 %v3290_v60 }
 0x320   :  { %2384 = vmatprep.subr.bf16.mxu0 %v3295_v61 }
 0x323   :  { %2385 = vmatpush2.bf16.msra.mxu0 %v3293_v62 }
 0x324   :  { %2386 = vmatprep.subr.bf16.mxu0 %v3298_v63 }
 0x327   :  { %2387 = vmatpush2.bf16.msra.mxu0 %v3296_v0 }
 0x328   :  { %2388 = vmatprep.subr.bf16.mxu0 %v3301_v1 }
 0x32b   :  { %2389 = vmatpush2.bf16.msra.mxu0 %v3299_v3 }
 0x32c   :  { %2390 = vmatprep.subr.bf16.mxu0 %v3304_v4 }
 0x32f   :  { %2391 = vmatpush2.bf16.msra.mxu0 %v3302_v7 }
 0x330   :  { %2392 = vmatprep.subr.bf16.mxu0 %v3307_v8 }
 0x333   :  { %2393 = vmatpush2.bf16.msra.mxu0 %v3305_v9 }
 0x336   :  { %2395 = vmatmul.mubr.bf16.vlgmr.msra.gmra.mxu0 %v3600_v35 }
 0x3b6   :  { %v1900_v10 = vpop.f32.mrf.mxu0  ;;  %v2169_v11 = vpop.f32.mrf.mxu1 }
 0x3b7   :  { %v2178_v25 = vrot.slane %v1900_v10, 7  ;;  %v2190_v26 = vrot.slane %v2169_v11, 1 }
 0x3b8   :  { %v1902_v12 = vpop.f32.mrf.mxu0  ;;  %v2171_v13 = vpop.f32.mrf.mxu1 }
 0x3b9   :  { %v2179_v27 = vrot.slane %v1902_v12, 7  ;;  %v2191_v49 = vrot.slane %v2171_v13, 1 }
 0x3ba   :  { %v1904_v16 = vpop.f32.mrf.mxu0  ;;  %v2173_v17 = vpop.f32.mrf.mxu1 }
 0x3bb   :  { %v2180_v19 = vrot.slane %v1904_v16, 7  ;;  %v2192_v5 = vrot.slane %v2173_v17, 1 }
 0x3bc   :  { %v1906_v18 = vpop.f32.mrf.mxu0  ;;  %v2175_v23 = vpop.f32.mrf.mxu1 }
 0x3bd   :  { %v2181_v6 = vrot.slane %v1906_v18, 7  ;;  %v2193_v28 = vrot.slane %v2175_v23, 1  ;;  %v2184_v29 = vsel %vm1155_vm1, %v2180_v19, %v2178_v25  ;;  %v2194_v51 = vsel %vm1168_vm4, %v2190_v26, %v2192_v5 }
 0x3be   :  { %v2186_v31 = vmul.f32 %v3510_v39, %v2184_v29  ;;  %v2182_v33 = vsel %vm1155_vm1, %v2178_v25, %v2180_v19  ;;  %v2198_v34 = vmul.f32 %v3521_v50, %v2194_v51  ;;  %v2196_v22 = vsel %vm1168_vm4, %v2192_v5, %v2190_v26  ;;  %v2473_v29 = vld [vmem:[%s3662_s8] sm:$0x3] }
 0x3bf   :  { %v2185_v30 = vsel %vm1155_vm1, %v2181_v6, %v2179_v27  ;;  %v2195_v14 = vsel %vm1168_vm4, %v2191_v49, %v2193_v28  ;;  %v2197_v37 = vsel %vm1168_vm4, %v2193_v28, %v2191_v49  ;;  %v2183_v40 = vsel %vm1155_vm1, %v2179_v27, %v2181_v6  ;;  %v2457_v28 = vld [vmem:[%s3661_s7] sm:$0x3]  ;;  %s3411_s7 = smov [#allocation9]  }
 0x3c0   :  { %v2187_v36 = vmul.f32 %v3510_v39, %v2185_v30  ;;  %v2199_v43 = vmul.f32 %v3521_v50, %v2195_v14  ;;  %v2188_v39 = vmul.f32 %v3523_v52, %v2182_v33  ;;  %v2200_v48 = vmul.f32 %v3540_v2, %v2196_v22  ;;  %v2493_v33 = vld [vmem:[%s3663_s9] sm:$0x3]  ;;  %s2552_s8 = sshll.u32 %s3411_s7, 4  ;;  %s2553_s8 = int_to_ptr.vmem [resolvable:$true] %s2552_s8 }
 0x3c1   :  { %v2189_v54 = vmul.f32 %v3523_v52, %v2183_v40  ;;  %v2201_v55 = vmul.f32 %v3540_v2, %v2197_v37  ;;  %v3410_v19 = vmov 0   ;;  %v2462_v49 = vrot.slane %v2457_v28, %v3518_v47  ;;  %s3376_s9 = scalar_lea.vmem %s2553_s8, 32  ;;  %p3381_p2 = scmp.lt.s32.totalorder %s2553_s8, %s2553_s8 }
 0x3c2   :  { %2869 = vset.pattern.permute.xlu0 %v3410_v19  ;;  %v2466_v51 = vrot.slane %v2457_v28, %v3533_v59  ;;  %v2478_v14 = vrot.slane %v2473_v29, %v3518_v47  ;;  %v2502_v22 = vrot.slane %v2493_v33, %v3533_v59  ;;  %p3377_p1 = scmp.ne.s32.totalorder %s2553_s8, %s3376_s9  ;;  %p3382_p3 = scmp.lt.s32.totalorder %s3376_s9, %s3376_s9 }
 0x3c4   :  { %p3383_p4 = por %p3382_p3, %p3381_p2 }
 0x3c6   :  { %p3384_p5 = pnand %p3383_p4, %p3377_p1 }
 0x3f6   :  { %v2396_v32 = vpop.f32.mrf.mxu0 }
 0x3f7   :  { %v2397_v35 = vadd.f32 %v2396_v32, %v2186_v31  ;;  %v2482_v32 = vrot.slane %v2473_v29, %v3533_v59  ;;  %v2858_v59 = vld [vmem:[#allocation2] ss:$0 sm:$0xff] }
 0x3f8   :  { %v2398_v38 = vpop.f32.mrf.mxu0 }
 0x3f9   :  { %v2405_v42 = vadd.f32 %v2397_v35, %v2198_v34  ;;  %v2399_v44 = vadd.f32 %v2398_v38, %v2187_v36 }
 0x3fa   :  { %v2400_v45 = vpop.f32.mrf.mxu0 }
 0x3fb   :  { %v2406_v46 = vadd.f32 %v2399_v44, %v2199_v43  ;;  %v2401_v53 = vadd.f32 %v2400_v45, %v2188_v39  ;;  %v2421_v60 = vadd.f32 %v2414_v20, %v2405_v42 }
 0x3fc   :  { %v2402_v56 = vpop.f32.mrf.mxu0 }
 0x3fd   :  { %v2407_v57 = vadd.f32 %v2401_v53, %v2200_v48  ;;  %v2403_v58 = vadd.f32 %v2402_v56, %v2189_v54  ;;  %v2422_v61 = vadd.f32 %v2418_v41, %v2406_v46 }
 0x3ff   :  { %v2408_v62 = vadd.f32 %v2403_v58, %v2201_v55  ;;  %v2425_v63 = vadd.f32 %v2422_v61, %v2421_v60  ;;  %v2423_v50 = vadd.f32 %v2414_v20, %v2407_v57  ;;  %v2498_v20 = vrot.slane %v2493_v33, %v3518_v47 }
 0x401   :  { %2426 = vadd.xlane.f32.xlu0 %v2425_v63  ;;  %v2424_v0 = vadd.f32 %v2418_v41, %v2408_v62 }
 0x403   :  { %v2428_v1 = vadd.f32 %v2424_v0, %v2423_v50 }
 0x405   :  { %2429 = vadd.xlane.f32.xlu1 %v2428_v1 }
 0x48a   :  { %v2427_v3 = vpop.xlane.xlu0 %2426 }
 0x48b   :  { %v2431_v4 = vmul.f32 0.00390625, %v2427_v3 }
 0x48d   :  { %v2433_v7 = vsub.f32 %v2421_v60, %v2431_v4  ;;  %v2434_v8 = vsub.f32 %v2422_v61, %v2431_v4  ;;  %v2532_v61 = vand.u32 127, %v82_v21 }
 0x48e   :  { %v2430_v9 = vpop.xlane.xlu1 %2429 }
 0x48f   :  { %v2432_v52 = vmul.f32 0.00390625, %v2430_v9  ;;  %v2437_v10 = vmul.f32 %v2433_v7, %v2433_v7  ;;  %v2438_v2 = vmul.f32 %v2434_v8, %v2434_v8 }
 0x491   :  { %v2435_v11 = vsub.f32 %v2423_v50, %v2432_v52  ;;  %v2436_v12 = vsub.f32 %v2424_v0, %v2432_v52  ;;  %v2441_v13 = vadd.f32 %v2438_v2, %v2437_v10  ;;  %v2535_v50 = vsub.s32 %v2532_v61, %v3505_v24 }
 0x493   :  { %2442 = vadd.xlane.f32.xlu0 %v2441_v13  ;;  %v2439_v16 = vmul.f32 %v2435_v11, %v2435_v11  ;;  %v2440_v17 = vmul.f32 %v2436_v12, %v2436_v12 }
 0x495   :  { %v2444_v18 = vadd.f32 %v2440_v17, %v2439_v16 }
 0x497   :  { %2445 = vadd.xlane.f32.xlu1 %v2444_v18 }
 0x51c   :  { %v2443_v23 = vpop.xlane.xlu0 %2442 }
 0x51d   :  { %v2447_v25 = vmul.f32 0.00390625, %v2443_v23 }
 0x51f   :  { %v2449_v5 = vadd.f32 1e-05, %v2447_v25 }
 0x520   :  { %v2446_v6 = vpop.xlane.xlu1 %2445 }
 0x521   :  { %3312 = vrsqrt.f32 %v2449_v5  ;;  %v2448_v26 = vmul.f32 0.00390625, %v2446_v6 }
 0x523   :  { %v2450_v27 = vadd.f32 1e-05, %v2448_v26 }
 0x525   :  { %3314 = vrsqrt.f32 %v2450_v27 }
 0x52e   :  { %v3313_v30 = vpop.eup %3312 }
 0x52f   :  { %v2453_v15 = vmul.f32 %v3313_v30, %v2433_v7  ;;  %v2454_v31 = vmul.f32 %v3313_v30, %v2434_v8 }
 0x531   :  { %v2469_v34 = vmul.f32 %v2462_v49, %v2453_v15  ;;  %v2470_v35 = vmul.f32 %v2466_v51, %v2454_v31 }
 0x532   :  { %v3315_v36 = vpop.eup %3314 }
 0x533   :  { %v2485_v37 = vadd.f32 %v2478_v14, %v2469_v34  ;;  %v2486_v38 = vadd.f32 %v2482_v32, %v2470_v35  ;;  %v2455_v40 = vmul.f32 %v3315_v36, %v2435_v11  ;;  %v2456_v41 = vmul.f32 %v3315_v36, %v2436_v12 }
 0x535   :  { %v2489_v42 = vmax.f32 %v2485_v37, 0.0  ;;  %v2490_v43 = vmax.f32 %v2486_v38, 0.0  ;;  %v2471_v44 = vmul.f32 %v2462_v49, %v2455_v40  ;;  %v2472_v39 = vmul.f32 %v2466_v51, %v2456_v41 }
 0x537   :  { %v2505_v45 = vmul.f32 %v2498_v20, %v2489_v42  ;;  %v2506_v46 = vmul.f32 %v2502_v22, %v2490_v43  ;;  %v2487_v48 = vadd.f32 %v2478_v14, %v2471_v44  ;;  %v2488_v53 = vadd.f32 %v2482_v32, %v2472_v39 }
 0x539   :  { %v2509_v54 = vadd.f32 %v2506_v46, %v2505_v45  ;;  %v2491_v55 = vmax.f32 %v2487_v48, 0.0  ;;  %v2492_v56 = vmax.f32 %v2488_v53, 0.0 }
 0x53b   :  { %2510 = vadd.xlane.f32.xlu0 %v2509_v54  ;;  %v2507_v57 = vmul.f32 %v2498_v20, %v2491_v55  ;;  %v2508_v47 = vmul.f32 %v2502_v22, %v2492_v56 }
 0x53d   :  { %v2512_v58 = vadd.f32 %v2508_v47, %v2507_v57 }
 0x53f   :  { %2513 = vadd.xlane.f32.xlu1 %v2512_v58 }
 0x551   :  { %2522 = vperm.xlu0 %2869, %v2858_v59  }
 0x5c4   :  { %v2511_v60 = vpop.xlane.xlu0 %2510 }
 0x5c8   :  { %v2514_v62 = vpop.xlane.xlu1 %2513 }
 0x5cc   :  { %v2523_v63 = vpop.permute.xlu0 %2522 }
 0x5cd   :  { %v2525_v0 = vadd.f32 %v2523_v63, %v2511_v60  ;;  %v2526_v1 = vadd.f32 %v2523_v63, %v2514_v62 }
 0x5cf   :  { %v2527_v3 = vmax.f32 %v2525_v0, 0.0  ;;  %v2528_v4 = vmax.f32 %v2526_v1, 0.0 }
 0x5d1   :  { %v2536_v7 = vrot.slane %v2527_v3, %v2535_v50  ;;  %v2540_v8 = vrot.slane %v2528_v4, %v2535_v50 }
 0x5d3   :  { %v2542_v9 = vsel %vm2541_vm6, %v2540_v8, %v2536_v7 }
 0x5d4   :  { %2545 = vst.msk [vmem:[#allocation9] sm:$0x3] %vm2544_vm7, %v2542_v9 }
 0x5d5   :  { %3387 = shalt.err (!%p3384_p5)
}
 0x5d6   :  { %2555 = dma.vmem_to_hbm [thread:$0]  %s2553_s8, 32, %s3665_s11, [#allocation5]  }
 0x5d7   :  { %3400 = dma.done.wait [#allocation5], 32  }
 0x5d8   :  { %3401 = vsyncadd [#allocation5], 4294967264 }
 0x5d9   :  { %2559 = vsyncpa [#allocation4], 1 }
 0x5da   :  { %2560 = vsyncpa [#allocation7], 1 }
 0x5db   :  { %2561 = vsyncpa [#allocation5], 1 }

</bundles_post_ra>
